<compile_context>
chip_gen: v7x
topology: tpu7x:2x2x1
jax: 0.10.0
libtpu: 0.0.40
codegen_flags: <defaults>
</compile_context>

<pallas_src>
import functools
import math

import jax
import jax.numpy as jnp
from jax import lax
from jax.experimental import pallas as pl
from jax.experimental.pallas import tpu as pltpu


_SQRT2_INV = 1.0 / math.sqrt(2.0)
_VMEM_LIMIT = 64 * 1024 * 1024     # sized for v7x (64 MiB); fine on v5e/v6e


def _row_tile(m, target=256):
    """Row tile size: `target` when it divides m evenly, else the whole axis.

    (Whole-axis fallback keeps the (8,128) block rule satisfied for odd sizes;
    at the toy test shapes every kernel is a single full-extent tile anyway.)
    """
    if m >= target and m % target == 0:
        return target
    return m


def _cparams():
    return pltpu.CompilerParams(dimension_semantics=("parallel",),
                                vmem_limit_bytes=_VMEM_LIMIT)


def _dot_bf16(a, w_bf16):
    # bf16 operands, f32 accumulation (MXU fast path on v5e/v6e/v7x).
    return jnp.dot(a.astype(jnp.bfloat16), w_bf16, preferred_element_type=jnp.float32)


# ----------------------------- Pallas kernels -----------------------------

def _reshaper_kernel(x_ref, w_ref, b_ref, a_ref, c_ref, o_ref):
    # Linear -> LeakyReLU(0.02) -> eval-mode NodeLevelBatchNorm (affine a*x + c)
    y = _dot_bf16(x_ref[...], w_ref[...]) + b_ref[...]
    y = jnp.where(y > 0, y, 0.02 * y)
    o_ref[...] = y * a_ref[...] + c_ref[...]


def reshaper(x, w_bf16, b, a, c):
    M, K = x.shape
    N = w_bf16.shape[1]
    tm = _row_tile(M, 512)
    full = lambda i: (0, 0)
    return pl.pallas_call(
        _reshaper_kernel,
        grid=(M // tm,),
        in_specs=[pl.BlockSpec((tm, K), lambda i: (i, 0)),
                  pl.BlockSpec((K, N), full),
                  pl.BlockSpec((1, N), full),
                  pl.BlockSpec((1, N), full),
                  pl.BlockSpec((1, N), full)],
        out_specs=pl.BlockSpec((tm, N), lambda i: (i, 0)),
        out_shape=jax.ShapeDtypeStruct((M, N), jnp.float32),
        compiler_params=_cparams(),
    )(x, w_bf16, b.reshape(1, N), a.reshape(1, N), c.reshape(1, N))


def _edge_score_kernel(xs_ref, xd_ref, ea_ref, wl_ref, bl_ref, wr_ref, br_ref,
                       we_ref, att_ref, o_ref):
    # GATv2 per-edge attention logits for all heads (lin_l/lin_r/lin_edge fused;
    # bn1 already folded into wl/wr).  Output is lane-dense (H, tE).
    t = (_dot_bf16(xs_ref[...], wl_ref[...]) + bl_ref[...]
         + _dot_bf16(xd_ref[...], wr_ref[...]) + br_ref[...]
         + _dot_bf16(ea_ref[...], we_ref[...]))
    t = jnp.where(t > 0, t, 0.2 * t)                    # leaky_relu(slope=0.2)
    # (H, H*C) @ (H*C, tE) on the MXU via block-diagonal att matrix.
    s = jnp.dot(att_ref[...], t.astype(jnp.bfloat16).T,
                preferred_element_type=jnp.float32)
    o_ref[...] = s.astype(o_ref.dtype)


def edge_scores(x_src, x_dst, attr, wl_bf16, bl, wr_bf16, br, we_bf16, att_hd_bf16):
    E, hidden = x_src.shape
    edge_dim = attr.shape[1]
    H, HC = att_hd_bf16.shape
    tE = _row_tile(E, 512)
    full = lambda i: (0, 0)
    return pl.pallas_call(
        _edge_score_kernel,
        grid=(E // tE,),
        in_specs=[pl.BlockSpec((tE, hidden), lambda i: (i, 0)),
                  pl.BlockSpec((tE, hidden), lambda i: (i, 0)),
                  pl.BlockSpec((tE, edge_dim), lambda i: (i, 0)),
                  pl.BlockSpec((hidden, HC), full),
                  pl.BlockSpec((1, HC), full),
                  pl.BlockSpec((hidden, HC), full),
                  pl.BlockSpec((1, HC), full),
                  pl.BlockSpec((edge_dim, HC), full),
                  pl.BlockSpec((H, HC), full)],
        out_specs=pl.BlockSpec((H, tE), lambda i: (0, i)),
        out_shape=jax.ShapeDtypeStruct((H, E), jnp.bfloat16),
        compiler_params=_cparams(),
    )(x_src, x_dst, attr, wl_bf16, bl.reshape(1, HC), wr_bf16, br.reshape(1, HC),
      we_bf16, att_hd_bf16)


def _egret_block_kernel(xq_ref, xf_ref, wl_ref, bl_ref, s_ref, bias_ref,
                        encw_ref, encb_ref, o_ref, *, heads, out_c):
    # xl over ALL key nodes (bn1-folded lin_l).  Recomputed per query tile so the
    # query grid axis stays safely "parallel" (no cross-step scratch dependence).
    xl16 = (_dot_bf16(xf_ref[...], wl_ref[...]) + bl_ref[...]).astype(jnp.bfloat16)

    parts = []
    for h in range(heads):                               # static unroll over heads
        s = s_ref[h].astype(jnp.float32)                 # (tq, N); -1e30 off-edge
        s = s - jnp.max(s, axis=-1, keepdims=True)
        p = jnp.exp(s)                                   # off-edge -> exact 0
        alpha = p * pl.reciprocal(jnp.sum(p, axis=-1, keepdims=True), approx=True)
        xl_h = xl16[:, h * out_c:(h + 1) * out_c]        # static per-head slice
        parts.append(jnp.dot(alpha.astype(jnp.bfloat16), xl_h,
                             preferred_element_type=jnp.float32))
    attn = jnp.concatenate(parts, axis=-1)               # (tq, heads*out_c)

    z = xq_ref[...] + attn + bias_ref[...]               # residual + GATv2 bias
    h1 = _dot_bf16(z, encw_ref[...]) + encb_ref[...]     # encoder Linear (bn2 folded)
    h1 = 0.5 * h1 * (1.0 + lax.erf(h1 * _SQRT2_INV))     # exact (erf) GELU
    o_ref[...] = z + h1                                  # second residual


def egret_block_compute(x, scores, wl_bf16, bl, gat_bias, encw_bf16, encb,
                        heads, out_c):
    N, hidden = x.shape
    HC = heads * out_c
    tq = _row_tile(N, 256)
    full = lambda i: (0, 0)
    return pl.pallas_call(
        functools.partial(_egret_block_kernel, heads=heads, out_c=out_c),
        grid=(N // tq,),
        in_specs=[pl.BlockSpec((tq, hidden), lambda i: (i, 0)),       # query tile
                  pl.BlockSpec((N, hidden), full),                    # all keys
                  pl.BlockSpec((hidden, HC), full),
                  pl.BlockSpec((1, HC), full),
                  pl.BlockSpec((heads, tq, N), lambda i: (0, i, 0)),  # bf16 logits
                  pl.BlockSpec((1, hidden), full),
                  pl.BlockSpec((hidden, hidden), full),
                  pl.BlockSpec((1, hidden), full)],
        out_specs=pl.BlockSpec((tq, hidden), lambda i: (i, 0)),
        out_shape=jax.ShapeDtypeStruct((N, hidden), jnp.float32),
        compiler_params=_cparams(),
    )(x, x, wl_bf16, bl.reshape(1, HC), scores, gat_bias.reshape(1, hidden),
      encw_bf16, encb.reshape(1, hidden))


def _mlp_kernel(x_ref, w1_ref, b1_ref, w2_ref, b2_ref, o_ref):
    h = _dot_bf16(x_ref[...], w1_ref[...]) + b1_ref[...]
    h = jnp.where(h > 0, h, 0.02 * h)                    # LeakyReLU(0.02)
    o_ref[...] = _dot_bf16(h, w2_ref[...]) + b2_ref[...]


def mlp_reducer(x, w1_bf16, b1, w2_bf16, b2):
    M, K = x.shape
    Hd = w1_bf16.shape[1]
    N = w2_bf16.shape[1]
    tm = _row_tile(M, 512)
    full = lambda i: (0, 0)
    return pl.pallas_call(
        _mlp_kernel,
        grid=(M // tm,),
        in_specs=[pl.BlockSpec((tm, K), lambda i: (i, 0)),
                  pl.BlockSpec((K, Hd), full),
                  pl.BlockSpec((1, Hd), full),
                  pl.BlockSpec((Hd, N), full),
                  pl.BlockSpec((1, N), full)],
        out_specs=pl.BlockSpec((tm, N), lambda i: (i, 0)),
        out_shape=jax.ShapeDtypeStruct((M, N), jnp.float32),
        compiler_params=_cparams(),
    )(x, w1_bf16, b1.reshape(1, Hd), w2_bf16, b2.reshape(1, N))


# ------------------------------- glue (JAX) --------------------------------

def _bn_affine(gamma, beta, rm, rv, eps=1e-5):
    # eval-mode BatchNorm == a * x + c
    a = gamma * lax.rsqrt(rv + eps)
    return a, beta - a * rm


def _fold_bn_into_linear(W, b, a, c):
    # Linear(W, b) applied to (a * x + c)  ==  (W * a) x + (W @ c + b)
    return W * a[None, :], b + W @ c


def add_self_loops_mean(src, dst, edge_attr, num_nodes):
    # torch_geometric add_self_loops(..., fill_value='mean'): self-loop attr is the
    # mean of edge_attr of incoming edges (indexed by edge_index[1]).
    F = edge_attr.shape[1]
    sums = jnp.zeros((num_nodes, F), jnp.float32).at[dst].add(edge_attr)
    cnts = jnp.zeros((num_nodes,), jnp.float32).at[dst].add(1.0)
    loop_attr = sums / jnp.maximum(cnts, 1.0)[:, None]
    ar = jnp.arange(num_nodes, dtype=src.dtype)
    return (jnp.concatenate([src, ar]),
            jnp.concatenate([dst, ar]),
            jnp.concatenate([edge_attr, loop_attr], axis=0))


def _prep_block(p, heads, out_c):
    """Fold eval-mode BNs into adjacent Linears; pre-cast all weights to bf16."""
    H, C = heads, out_c
    HC = H * C
    a1, c1 = _bn_affine(p["bn1_g"], p["bn1_b"], p["bn1_rm"], p["bn1_rv"])
    Wl_f, bl_f = _fold_bn_into_linear(p["Wl"], p["bl"], a1, c1)
    Wr_f, br_f = _fold_bn_into_linear(p["Wr"], p["br"], a1, c1)
    a2, c2 = _bn_affine(p["bn2_g"], p["bn2_b"], p["bn2_rm"], p["bn2_rv"])
    encW_f, encb_f = _fold_bn_into_linear(p["enc_W"], p["enc_b"], a2, c2)
    # block-diagonal att matrix, row h = [0.., att[h,:], ..0]  -> (H, H*C)
    att_hd = (p["att"][:, None, :] * jnp.eye(H, dtype=jnp.float32)[:, :, None]
              ).reshape(H, HC)
    return dict(
        Wl_t=Wl_f.T.astype(jnp.bfloat16), bl=bl_f,
        Wr_t=Wr_f.T.astype(jnp.bfloat16), br=br_f,
        We_t=p["We"].T.astype(jnp.bfloat16),
        att_hd=att_hd.astype(jnp.bfloat16),
        gat_bias=p["bias"],
        encW_t=encW_f.T.astype(jnp.bfloat16), encb=encb_f,
    )


def egret_block(x, src_f, dst_f, attr_f, neg_base, bp, heads, out_c):
    # (1) per-edge attention logits, lane-dense (H, E) bf16 (no (N,N,H*C) tensor,
    #     no host-side transpose); per-edge rows of x gathered in JAX.
    s_he = edge_scores(x[src_f], x[dst_f], attr_f,
                       bp["Wl_t"], bp["bl"], bp["Wr_t"], bp["br"],
                       bp["We_t"], bp["att_hd"])
    # scatter into the hoisted -1e30 bf16 base -> compact (H, N, N) logits
    # (self loops guarantee every softmax row has at least one finite entry)
    scores = neg_base.at[:, dst_f, src_f].set(s_he)
    # (2) softmax + per-head aggregation + residual + encoder MLP + residual
    return egret_block_compute(x, scores, bp["Wl_t"], bp["bl"], bp["gat_bias"],
                               bp["encW_t"], bp["encb"], heads, out_c)


def graph_encoder(x, edge_index, edge_attr, params, num_nodes, heads):
    src, dst = edge_index[0], edge_index[1]
    hidden = params["rs_W"].shape[0]
    out_c = hidden // heads

    # reshaper: Linear -> LeakyReLU(0.02) -> eval BN (fused) -> Dropout(eval: id)
    a_rs, c_rs = _bn_affine(params["rs_bn_g"], params["rs_bn_b"],
                            params["rs_bn_rm"], params["rs_bn_rv"])
    z = reshaper(x, params["rs_W"].T.astype(jnp.bfloat16), params["rs_b"],
                 a_rs, c_rs)

    # self-loop insertion and the dense -inf logits base are identical for every
    # block -> hoisted out of the loop
    src_f, dst_f, attr_f = add_self_loops_mean(src, dst, edge_attr, num_nodes)
    neg_base = jnp.full((heads, num_nodes, num_nodes), -1e30, dtype=jnp.bfloat16)

    for p in params["blocks"]:
        bp = _prep_block(p, heads, out_c)
        z = egret_block(z, src_f, dst_f, attr_f, neg_base, bp, heads, out_c)

    # reducer (Mlp, LeakyReLU(0.02)): fc1 -> act -> (drop) -> fc2 -> (drop)
    return mlp_reducer(z, params["fc1_W"].T.astype(jnp.bfloat16), params["fc1_b"],
                       params["fc2_W"].T.astype(jnp.bfloat16), params["fc2_b"])


# ------------------------------ param init ---------------------------------

def init_params(key, in_dim, hidden_dim, out_dim, edge_dim, layer_count, heads):
    out_c = hidden_dim // heads

    def nrm(k, shape):
        return 0.1 * jax.random.normal(k, shape, dtype=jnp.float32)

    keys = iter(jax.random.split(key, 8 + 16 * layer_count))
    zeros = jnp.zeros((hidden_dim,), jnp.float32)
    ones = jnp.ones((hidden_dim,), jnp.float32)
    params = {
        "rs_W": nrm(next(keys), (hidden_dim, in_dim)),
        "rs_b": nrm(next(keys), (hidden_dim,)),
        "rs_bn_g": 1.0 + nrm(next(keys), (hidden_dim,)),
        "rs_bn_b": nrm(next(keys), (hidden_dim,)),
        "rs_bn_rm": zeros, "rs_bn_rv": ones,          # fresh-module running stats
        "fc1_W": nrm(next(keys), (hidden_dim, hidden_dim)),
        "fc1_b": nrm(next(keys), (hidden_dim,)),
        "fc2_W": nrm(next(keys), (out_dim, hidden_dim)),
        "fc2_b": nrm(next(keys), (out_dim,)),
        "blocks": [],
    }
    for _ in range(layer_count):
        blk = {
            "bn1_g": 1.0 + nrm(next(keys), (hidden_dim,)),
            "bn1_b": nrm(next(keys), (hidden_dim,)),
            "bn1_rm": zeros, "bn1_rv": ones,
            "Wl": nrm(next(keys), (heads * out_c, hidden_dim)),
            "bl": nrm(next(keys), (heads * out_c,)),
            "Wr": nrm(next(keys), (heads * out_c, hidden_dim)),
            "br": nrm(next(keys), (heads * out_c,)),
            "We": nrm(next(keys), (heads * out_c, edge_dim)),
            "att": nrm(next(keys), (heads, out_c)),
            "bias": nrm(next(keys), (heads * out_c,)),
            "bn2_g": 1.0 + nrm(next(keys), (hidden_dim,)),
            "bn2_b": nrm(next(keys), (hidden_dim,)),
            "bn2_rm": zeros, "bn2_rv": ones,
            "enc_W": nrm(next(keys), (hidden_dim, hidden_dim)),
            "enc_b": nrm(next(keys), (hidden_dim,)),
        }
        params["blocks"].append(blk)
    return params


# --------------------------------- main -------------------------------------

if __name__ == "__main__":
    IN_DIM, HIDDEN, OUT_DIM, EDGE_DIM = 8, 32, 16, 8
    LAYERS, HEADS = 2, 4
    N_NODES, N_EDGES = 16, 24

    key = jax.random.PRNGKey(0)
    kx, ke, kp = jax.random.split(key, 3)

    x = jax.random.normal(kx, (N_NODES, IN_DIM), dtype=jnp.float32)
    edge_attr = jax.random.normal(ke, (N_EDGES, EDGE_DIM), dtype=jnp.float32)

    # deterministic edge set, no self loops, unique (src, dst) pairs
    src0 = jnp.arange(16) % N_NODES
    dst0 = (src0 + 1) % N_NODES
    src1 = jnp.arange(8) % N_NODES
    dst1 = (src1 + 3) % N_NODES
    edge_index = jnp.stack([jnp.concatenate([src0, src1]),
                            jnp.concatenate([dst0, dst1])]).astype(jnp.int32)

    params = init_params(kp, IN_DIM, HIDDEN, OUT_DIM, EDGE_DIM, LAYERS, HEADS)

    fwd = jax.jit(functools.partial(graph_encoder, num_nodes=N_NODES, heads=HEADS))
    out = jax.block_until_ready(fwd(x, edge_index, edge_attr, params))
    assert out.shape == (N_NODES, OUT_DIM)
    assert bool(jnp.all(jnp.isfinite(out)))
    print("KERNEL_OK")
</pallas_src>

<mosaic_0001>
module attributes {stable_mosaic.version = 11 : i64} {
  func.func @_reshaper_kernel(%arg0: i32, %arg1: memref<16x8xf32, #tpu.memory_space<vmem>>, %arg2: memref<8x32xbf16, #tpu.memory_space<vmem>>, %arg3: memref<1x32xf32, #tpu.memory_space<vmem>>, %arg4: memref<1x32xf32, #tpu.memory_space<vmem>>, %arg5: memref<1x32xf32, #tpu.memory_space<vmem>>, %arg6: memref<16x32xf32, #tpu.memory_space<vmem>>) attributes {dimension_semantics = [#tpu.dimension_semantics<parallel>], iteration_bounds = array<i64: 1>, scalar_prefetch = 0 : i64, scratch_operands = 0 : i64, tpu.core_type = #tpu.core_type<tc>, window_params = [{transform_indices = @transform_0, window_bounds = array<i64: 16, 8>}, {pipeline_mode = #tpu.pipeline_mode<synchronous>, transform_indices = @transform_1, window_bounds = array<i64: 8, 32>}, {pipeline_mode = #tpu.pipeline_mode<synchronous>, transform_indices = @transform_2, window_bounds = array<i64: 1, 32>}, {pipeline_mode = #tpu.pipeline_mode<synchronous>, transform_indices = @transform_3, window_bounds = array<i64: 1, 32>}, {pipeline_mode = #tpu.pipeline_mode<synchronous>, transform_indices = @transform_4, window_bounds = array<i64: 1, 32>}, {transform_indices = @transform_5, window_bounds = array<i64: 16, 32>}]} {
    %c0 = arith.constant 0 : index
    %c0_0 = arith.constant 0 : index
    %0 = vector.load %arg1[%c0, %c0_0] : memref<16x8xf32, #tpu.memory_space<vmem>>, vector<16x8xf32>
    %c0_1 = arith.constant 0 : index
    %c0_2 = arith.constant 0 : index
    %1 = vector.load %arg2[%c0_1, %c0_2] : memref<8x32xbf16, #tpu.memory_space<vmem>>, vector<8x32xbf16>
    %2 = arith.truncf %0 : vector<16x8xf32> to vector<16x8xbf16>
    %cst = arith.constant dense<0.000000e+00> : vector<16x32xf32>
    %3 = tpu.matmul %2, %1, %cst {dimension_numbers = #tpu.dot_dimension_numbers<[1], [0], [0], [1], [0, 0, 1, 1], [], []>} : vector<16x8xbf16>, vector<8x32xbf16>, vector<16x32xf32> -> vector<16x32xf32>
    %c0_3 = arith.constant 0 : index
    %c0_4 = arith.constant 0 : index
    %4 = vector.load %arg3[%c0_3, %c0_4] : memref<1x32xf32, #tpu.memory_space<vmem>>, vector<1x32xf32>
    %5 = vector.broadcast %4 : vector<1x32xf32> to vector<16x32xf32>
    %6 = arith.addf %3, %5 : vector<16x32xf32>
    %cst_5 = arith.constant 0.000000e+00 : f32
    %7 = vector.broadcast %cst_5 : f32 to vector<16x32xf32>
    %8 = arith.cmpf ogt, %6, %7 : vector<16x32xf32>
    %cst_6 = arith.constant 2.000000e-02 : f32
    %9 = vector.broadcast %cst_6 : f32 to vector<16x32xf32>
    %10 = arith.mulf %9, %6 : vector<16x32xf32>
    %11 = arith.select %8, %6, %10 : vector<16x32xi1>, vector<16x32xf32>
    %c0_7 = arith.constant 0 : index
    %c0_8 = arith.constant 0 : index
    %12 = vector.load %arg4[%c0_7, %c0_8] : memref<1x32xf32, #tpu.memory_space<vmem>>, vector<1x32xf32>
    %13 = vector.broadcast %12 : vector<1x32xf32> to vector<16x32xf32>
    %14 = arith.mulf %11, %13 : vector<16x32xf32>
    %c0_9 = arith.constant 0 : index
    %c0_10 = arith.constant 0 : index
    %15 = vector.load %arg5[%c0_9, %c0_10] : memref<1x32xf32, #tpu.memory_space<vmem>>, vector<1x32xf32>
    %16 = vector.broadcast %15 : vector<1x32xf32> to vector<16x32xf32>
    %17 = arith.addf %14, %16 : vector<16x32xf32>
    %c0_11 = arith.constant 0 : index
    %c0_12 = arith.constant 0 : index
    %18 = vector.load %arg6[%c0_11, %c0_12] : memref<16x32xf32, #tpu.memory_space<vmem>>, vector<16x32xf32>
    tpu.vector_store %arg6[%c0_11, %c0_12], %17 {strides = array<i32>} : memref<16x32xf32, #tpu.memory_space<vmem>>, vector<16x32xf32>,
    return
  }
  func.func @transform_0(%arg0: i32) -> (i32, i32) {
    %c0_i32 = arith.constant 0 : i32
    %c0_i32_0 = arith.constant 0 : i32
    return %arg0, %c0_i32 : i32, i32
  }
  func.func @transform_1(%arg0: i32) -> (i32, i32) {
    %c0_i32 = arith.constant 0 : i32
    %c0_i32_0 = arith.constant 0 : i32
    %c0_i32_1 = arith.constant 0 : i32
    return %c0_i32, %c0_i32_0 : i32, i32
  }
  func.func @transform_2(%arg0: i32) -> (i32, i32) {
    %c0_i32 = arith.constant 0 : i32
    %c0_i32_0 = arith.constant 0 : i32
    %c0_i32_1 = arith.constant 0 : i32
    return %c0_i32, %c0_i32_0 : i32, i32
  }
  func.func @transform_3(%arg0: i32) -> (i32, i32) {
    %c0_i32 = arith.constant 0 : i32
    %c0_i32_0 = arith.constant 0 : i32
    %c0_i32_1 = arith.constant 0 : i32
    return %c0_i32, %c0_i32_0 : i32, i32
  }
  func.func @transform_4(%arg0: i32) -> (i32, i32) {
    %c0_i32 = arith.constant 0 : i32
    %c0_i32_0 = arith.constant 0 : i32
    %c0_i32_1 = arith.constant 0 : i32
    return %c0_i32, %c0_i32_0 : i32, i32
  }
  func.func @transform_5(%arg0: i32) -> (i32, i32) {
    %c0_i32 = arith.constant 0 : i32
    %c0_i32_0 = arith.constant 0 : i32
    return %arg0, %c0_i32 : i32, i32
  }
}

module attributes {stable_mosaic.version = 11 : i64} {
  func.func @_edge_score_kernel(%arg0: i32, %arg1: memref<40x32xf32, #tpu.memory_space<vmem>>, %arg2: memref<40x32xf32, #tpu.memory_space<vmem>>, %arg3: memref<40x8xf32, #tpu.memory_space<vmem>>, %arg4: memref<32x32xbf16, #tpu.memory_space<vmem>>, %arg5: memref<1x32xf32, #tpu.memory_space<vmem>>, %arg6: memref<32x32xbf16, #tpu.memory_space<vmem>>, %arg7: memref<1x32xf32, #tpu.memory_space<vmem>>, %arg8: memref<8x32xbf16, #tpu.memory_space<vmem>>, %arg9: memref<4x32xbf16, #tpu.memory_space<vmem>>, %arg10: memref<4x40xbf16, #tpu.memory_space<vmem>>) attributes {dimension_semantics = [#tpu.dimension_semantics<parallel>], iteration_bounds = array<i64: 1>, scalar_prefetch = 0 : i64, scratch_operands = 0 : i64, tpu.core_type = #tpu.core_type<tc>, window_params = [{transform_indices = @transform_0, window_bounds = array<i64: 40, 32>}, {transform_indices = @transform_1, window_bounds = array<i64: 40, 32>}, {transform_indices = @transform_2, window_bounds = array<i64: 40, 8>}, {pipeline_mode = #tpu.pipeline_mode<synchronous>, transform_indices = @transform_3, window_bounds = array<i64: 32, 32>}, {pipeline_mode = #tpu.pipeline_mode<synchronous>, transform_indices = @transform_4, window_bounds = array<i64: 1, 32>}, {pipeline_mode = #tpu.pipeline_mode<synchronous>, transform_indices = @transform_5, window_bounds = array<i64: 32, 32>}, {pipeline_mode = #tpu.pipeline_mode<synchronous>, transform_indices = @transform_6, window_bounds = array<i64: 1, 32>}, {pipeline_mode = #tpu.pipeline_mode<synchronous>, transform_indices = @transform_7, window_bounds = array<i64: 8, 32>}, {pipeline_mode = #tpu.pipeline_mode<synchronous>, transform_indices = @transform_8, window_bounds = array<i64: 4, 32>}, {transform_indices = @transform_9, window_bounds = array<i64: 4, 40>}]} {
    %c0 = arith.constant 0 : index
    %c0_0 = arith.constant 0 : index
    %0 = vector.load %arg1[%c0, %c0_0] : memref<40x32xf32, #tpu.memory_space<vmem>>, vector<40x32xf32>
    %c0_1 = arith.constant 0 : index
    %c0_2 = arith.constant 0 : index
    %1 = vector.load %arg4[%c0_1, %c0_2] : memref<32x32xbf16, #tpu.memory_space<vmem>>, vector<32x32xbf16>
    %2 = arith.truncf %0 : vector<40x32xf32> to vector<40x32xbf16>
    %cst = arith.constant dense<0.000000e+00> : vector<40x32xf32>
    %3 = tpu.matmul %2, %1, %cst {dimension_numbers = #tpu.dot_dimension_numbers<[1], [0], [0], [1], [0, 0, 1, 1], [], []>} : vector<40x32xbf16>, vector<32x32xbf16>, vector<40x32xf32> -> vector<40x32xf32>
    %c0_3 = arith.constant 0 : index
    %c0_4 = arith.constant 0 : index
    %4 = vector.load %arg5[%c0_3, %c0_4] : memref<1x32xf32, #tpu.memory_space<vmem>>, vector<1x32xf32>
    %5 = vector.broadcast %4 : vector<1x32xf32> to vector<40x32xf32>
    %6 = arith.addf %3, %5 : vector<40x32xf32>
    %c0_5 = arith.constant 0 : index
    %c0_6 = arith.constant 0 : index
    %7 = vector.load %arg2[%c0_5, %c0_6] : memref<40x32xf32, #tpu.memory_space<vmem>>, vector<40x32xf32>
    %c0_7 = arith.constant 0 : index
    %c0_8 = arith.constant 0 : index
    %8 = vector.load %arg6[%c0_7, %c0_8] : memref<32x32xbf16, #tpu.memory_space<vmem>>, vector<32x32xbf16>
    %9 = arith.truncf %7 : vector<40x32xf32> to vector<40x32xbf16>
    %cst_9 = arith.constant dense<0.000000e+00> : vector<40x32xf32>
    %10 = tpu.matmul %9, %8, %cst_9 {dimension_numbers = #tpu.dot_dimension_numbers<[1], [0], [0], [1], [0, 0, 1, 1], [], []>} : vector<40x32xbf16>, vector<32x32xbf16>, vector<40x32xf32> -> vector<40x32xf32>
    %11 = arith.addf %6, %10 : vector<40x32xf32>
    %c0_10 = arith.constant 0 : index
    %c0_11 = arith.constant 0 : index
    %12 = vector.load %arg7[%c0_10, %c0_11] : memref<1x32xf32, #tpu.memory_space<vmem>>, vector<1x32xf32>
    %13 = vector.broadcast %12 : vector<1x32xf32> to vector<40x32xf32>
    %14 = arith.addf %11, %13 : vector<40x32xf32>
    %c0_12 = arith.constant 0 : index
    %c0_13 = arith.constant 0 : index
    %15 = vector.load %arg3[%c0_12, %c0_13] : memref<40x8xf32, #tpu.memory_space<vmem>>, vector<40x8xf32>
    %c0_14 = arith.constant 0 : index
    %c0_15 = arith.constant 0 : index
    %16 = vector.load %arg8[%c0_14, %c0_15] : memref<8x32xbf16, #tpu.memory_space<vmem>>, vector<8x32xbf16>
    %17 = arith.truncf %15 : vector<40x8xf32> to vector<40x8xbf16>
    %cst_16 = arith.constant dense<0.000000e+00> : vector<40x32xf32>
    %18 = tpu.matmul %17, %16, %cst_16 {dimension_numbers = #tpu.dot_dimension_numbers<[1], [0], [0], [1], [0, 0, 1, 1], [], []>} : vector<40x8xbf16>, vector<8x32xbf16>, vector<40x32xf32> -> vector<40x32xf32>
    %19 = arith.addf %14, %18 : vector<40x32xf32>
    %cst_17 = arith.constant 0.000000e+00 : f32
    %20 = vector.broadcast %cst_17 : f32 to vector<40x32xf32>
    %21 = arith.cmpf ogt, %19, %20 : vector<40x32xf32>
    %cst_18 = arith.constant 2.000000e-01 : f32
    %22 = vector.broadcast %cst_18 : f32 to vector<40x32xf32>
    %23 = arith.mulf %22, %19 : vector<40x32xf32>
    %24 = arith.select %21, %19, %23 : vector<40x32xi1>, vector<40x32xf32>
    %c0_19 = arith.constant 0 : index
    %c0_20 = arith.constant 0 : index
    %25 = vector.load %arg9[%c0_19, %c0_20] : memref<4x32xbf16, #tpu.memory_space<vmem>>, vector<4x32xbf16>
    %26 = arith.truncf %24 : vector<40x32xf32> to vector<40x32xbf16>
    %27 = tpu.transpose %26, [1, 0] : vector<40x32xbf16> -> vector<32x40xbf16>
    %cst_21 = arith.constant dense<0.000000e+00> : vector<4x40xf32>
    %28 = tpu.matmul %25, %27, %cst_21 {dimension_numbers = #tpu.dot_dimension_numbers<[1], [0], [0], [1], [0, 0, 1, 1], [], []>} : vector<4x32xbf16>, vector<32x40xbf16>, vector<4x40xf32> -> vector<4x40xf32>
    %29 = arith.truncf %28 : vector<4x40xf32> to vector<4x40xbf16>
    %c0_22 = arith.constant 0 : index
    %c0_23 = arith.constant 0 : index
    %30 = vector.load %arg10[%c0_22, %c0_23] : memref<4x40xbf16, #tpu.memory_space<vmem>>, vector<4x40xbf16>
    tpu.vector_store %arg10[%c0_22, %c0_23], %29 {strides = array<i32>} : memref<4x40xbf16, #tpu.memory_space<vmem>>, vector<4x40xbf16>,
    return
  }
  func.func @transform_0(%arg0: i32) -> (i32, i32) {
    %c0_i32 = arith.constant 0 : i32
    %c0_i32_0 = arith.constant 0 : i32
    return %arg0, %c0_i32 : i32, i32
  }
  func.func @transform_1(%arg0: i32) -> (i32, i32) {
    %c0_i32 = arith.constant 0 : i32
    %c0_i32_0 = arith.constant 0 : i32
    return %arg0, %c0_i32 : i32, i32
  }
  func.func @transform_2(%arg0: i32) -> (i32, i32) {
    %c0_i32 = arith.constant 0 : i32
    %c0_i32_0 = arith.constant 0 : i32
    return %arg0, %c0_i32 : i32, i32
  }
  func.func @transform_3(%arg0: i32) -> (i32, i32) {
    %c0_i32 = arith.constant 0 : i32
    %c0_i32_0 = arith.constant 0 : i32
    %c0_i32_1 = arith.constant 0 : i32
    return %c0_i32, %c0_i32_0 : i32, i32
  }
  func.func @transform_4(%arg0: i32) -> (i32, i32) {
    %c0_i32 = arith.constant 0 : i32
    %c0_i32_0 = arith.constant 0 : i32
    %c0_i32_1 = arith.constant 0 : i32
    return %c0_i32, %c0_i32_0 : i32, i32
  }
  func.func @transform_5(%arg0: i32) -> (i32, i32) {
    %c0_i32 = arith.constant 0 : i32
    %c0_i32_0 = arith.constant 0 : i32
    %c0_i32_1 = arith.constant 0 : i32
    return %c0_i32, %c0_i32_0 : i32, i32
  }
  func.func @transform_6(%arg0: i32) -> (i32, i32) {
    %c0_i32 = arith.constant 0 : i32
    %c0_i32_0 = arith.constant 0 : i32
    %c0_i32_1 = arith.constant 0 : i32
    return %c0_i32, %c0_i32_0 : i32, i32
  }
  func.func @transform_7(%arg0: i32) -> (i32, i32) {
    %c0_i32 = arith.constant 0 : i32
    %c0_i32_0 = arith.constant 0 : i32
    %c0_i32_1 = arith.constant 0 : i32
    return %c0_i32, %c0_i32_0 : i32, i32
  }
  func.func @transform_8(%arg0: i32) -> (i32, i32) {
    %c0_i32 = arith.constant 0 : i32
    %c0_i32_0 = arith.constant 0 : i32
    %c0_i32_1 = arith.constant 0 : i32
    return %c0_i32, %c0_i32_0 : i32, i32
  }
  func.func @transform_9(%arg0: i32) -> (i32, i32) {
    %c0_i32 = arith.constant 0 : i32
    %c0_i32_0 = arith.constant 0 : i32
    return %c0_i32, %arg0 : i32, i32
  }
}

module attributes {stable_mosaic.version = 11 : i64} {
  func.func @_egret_block_kernel(%arg0: i32, %arg1: memref<16x32xf32, #tpu.memory_space<vmem>>, %arg2: memref<16x32xf32, #tpu.memory_space<vmem>>, %arg3: memref<32x32xbf16, #tpu.memory_space<vmem>>, %arg4: memref<1x32xf32, #tpu.memory_space<vmem>>, %arg5: memref<4x16x16xbf16, #tpu.memory_space<vmem>>, %arg6: memref<1x32xf32, #tpu.memory_space<vmem>>, %arg7: memref<32x32xbf16, #tpu.memory_space<vmem>>, %arg8: memref<1x32xf32, #tpu.memory_space<vmem>>, %arg9: memref<16x32xf32, #tpu.memory_space<vmem>>) attributes {dimension_semantics = [#tpu.dimension_semantics<parallel>], iteration_bounds = array<i64: 1>, scalar_prefetch = 0 : i64, scratch_operands = 0 : i64, tpu.core_type = #tpu.core_type<tc>, window_params = [{transform_indices = @transform_0, window_bounds = array<i64: 16, 32>}, {pipeline_mode = #tpu.pipeline_mode<synchronous>, transform_indices = @transform_1, window_bounds = array<i64: 16, 32>}, {pipeline_mode = #tpu.pipeline_mode<synchronous>, transform_indices = @transform_2, window_bounds = array<i64: 32, 32>}, {pipeline_mode = #tpu.pipeline_mode<synchronous>, transform_indices = @transform_3, window_bounds = array<i64: 1, 32>}, {transform_indices = @transform_4, window_bounds = array<i64: 4, 16, 16>}, {pipeline_mode = #tpu.pipeline_mode<synchronous>, transform_indices = @transform_5, window_bounds = array<i64: 1, 32>}, {pipeline_mode = #tpu.pipeline_mode<synchronous>, transform_indices = @transform_6, window_bounds = array<i64: 32, 32>}, {pipeline_mode = #tpu.pipeline_mode<synchronous>, transform_indices = @transform_7, window_bounds = array<i64: 1, 32>}, {transform_indices = @transform_8, window_bounds = array<i64: 16, 32>}]} {
    %c0 = arith.constant 0 : index
    %c0_0 = arith.constant 0 : index
    %0 = vector.load %arg2[%c0, %c0_0] : memref<16x32xf32, #tpu.memory_space<vmem>>, vector<16x32xf32>
    %c0_1 = arith.constant 0 : index
    %c0_2 = arith.constant 0 : index
    %1 = vector.load %arg3[%c0_1, %c0_2] : memref<32x32xbf16, #tpu.memory_space<vmem>>, vector<32x32xbf16>
    %2 = arith.truncf %0 : vector<16x32xf32> to vector<16x32xbf16>
    %cst = arith.constant dense<0.000000e+00> : vector<16x32xf32>
    %3 = tpu.matmul %2, %1, %cst {dimension_numbers = #tpu.dot_dimension_numbers<[1], [0], [0], [1], [0, 0, 1, 1], [], []>} : vector<16x32xbf16>, vector<32x32xbf16>, vector<16x32xf32> -> vector<16x32xf32>
    %c0_3 = arith.constant 0 : index
    %c0_4 = arith.constant 0 : index
    %4 = vector.load %arg4[%c0_3, %c0_4] : memref<1x32xf32, #tpu.memory_space<vmem>>, vector<1x32xf32>
    %5 = vector.broadcast %4 : vector<1x32xf32> to vector<16x32xf32>
    %6 = arith.addf %3, %5 : vector<16x32xf32>
    %7 = arith.truncf %6 : vector<16x32xf32> to vector<16x32xbf16>
    %c0_5 = arith.constant 0 : index
    %c0_6 = arith.constant 0 : index
    %c0_7 = arith.constant 0 : index
    %8 = vector.load %arg5[%c0_5, %c0_6, %c0_7] : memref<4x16x16xbf16, #tpu.memory_space<vmem>>, vector<1x16x16xbf16>
    %9 = vector.shape_cast %8 : vector<1x16x16xbf16> to vector<16x16xbf16>
    %10 = arith.extf %9 : vector<16x16xbf16> to vector<16x16xf32>
    %cst_8 = arith.constant dense<0xFF800000> : vector<16xf32>
    %11 = vector.multi_reduction <maximumf>, %10, %cst_8 [1] : vector<16x16xf32> to vector<16xf32>
    %12 = vector.shape_cast %11 : vector<16xf32> to vector<16x1xf32>
    %13 = vector.broadcast %12 : vector<16x1xf32> to vector<16x16xf32>
    %14 = arith.subf %10, %13 : vector<16x16xf32>
    %15 = math.exp %14 : vector<16x16xf32>
    %cst_9 = arith.constant dense<0.000000e+00> : vector<16xf32>
    %16 = vector.multi_reduction <add>, %15, %cst_9 [1] : vector<16x16xf32> to vector<16xf32>
    %17 = vector.shape_cast %16 : vector<16xf32> to vector<16x1xf32>
    %18 = tpu.reciprocal %17 {approx = true} : vector<16x1xf32> -> vector<16x1xf32>
    %19 = vector.broadcast %18 : vector<16x1xf32> to vector<16x16xf32>
    %20 = arith.mulf %15, %19 : vector<16x16xf32>
    %21 = vector.extract_strided_slice %7 {offsets = [0, 0], sizes = [16, 8], strides = [1, 1]} : vector<16x32xbf16> to vector<16x8xbf16>
    %22 = arith.truncf %20 : vector<16x16xf32> to vector<16x16xbf16>
    %cst_10 = arith.constant dense<0.000000e+00> : vector<16x8xf32>
    %23 = tpu.matmul %22, %21, %cst_10 {dimension_numbers = #tpu.dot_dimension_numbers<[1], [0], [0], [1], [0, 0, 1, 1], [], []>} : vector<16x16xbf16>, vector<16x8xbf16>, vector<16x8xf32> -> vector<16x8xf32>
    %c1 = arith.constant 1 : index
    %c0_11 = arith.constant 0 : index
    %c0_12 = arith.constant 0 : index
    %24 = vector.load %arg5[%c1, %c0_11, %c0_12] : memref<4x16x16xbf16, #tpu.memory_space<vmem>>, vector<1x16x16xbf16>
    %25 = vector.shape_cast %24 : vector<1x16x16xbf16> to vector<16x16xbf16>
    %26 = arith.extf %25 : vector<16x16xbf16> to vector<16x16xf32>
    %cst_13 = arith.constant dense<0xFF800000> : vector<16xf32>
    %27 = vector.multi_reduction <maximumf>, %26, %cst_13 [1] : vector<16x16xf32> to vector<16xf32>
    %28 = vector.shape_cast %27 : vector<16xf32> to vector<16x1xf32>
    %29 = vector.broadcast %28 : vector<16x1xf32> to vector<16x16xf32>
    %30 = arith.subf %26, %29 : vector<16x16xf32>
    %31 = math.exp %30 : vector<16x16xf32>
    %cst_14 = arith.constant dense<0.000000e+00> : vector<16xf32>
    %32 = vector.multi_reduction <add>, %31, %cst_14 [1] : vector<16x16xf32> to vector<16xf32>
    %33 = vector.shape_cast %32 : vector<16xf32> to vector<16x1xf32>
    %34 = tpu.reciprocal %33 {approx = true} : vector<16x1xf32> -> vector<16x1xf32>
    %35 = vector.broadcast %34 : vector<16x1xf32> to vector<16x16xf32>
    %36 = arith.mulf %31, %35 : vector<16x16xf32>
    %37 = vector.extract_strided_slice %7 {offsets = [0, 8], sizes = [16, 8], strides = [1, 1]} : vector<16x32xbf16> to vector<16x8xbf16>
    %38 = arith.truncf %36 : vector<16x16xf32> to vector<16x16xbf16>
    %cst_15 = arith.constant dense<0.000000e+00> : vector<16x8xf32>
    %39 = tpu.matmul %38, %37, %cst_15 {dimension_numbers = #tpu.dot_dimension_numbers<[1], [0], [0], [1], [0, 0, 1, 1], [], []>} : vector<16x16xbf16>, vector<16x8xbf16>, vector<16x8xf32> -> vector<16x8xf32>
    %c2 = arith.constant 2 : index
    %c0_16 = arith.constant 0 : index
    %c0_17 = arith.constant 0 : index
    %40 = vector.load %arg5[%c2, %c0_16, %c0_17] : memref<4x16x16xbf16, #tpu.memory_space<vmem>>, vector<1x16x16xbf16>
    %41 = vector.shape_cast %40 : vector<1x16x16xbf16> to vector<16x16xbf16>
    %42 = arith.extf %41 : vector<16x16xbf16> to vector<16x16xf32>
    %cst_18 = arith.constant dense<0xFF800000> : vector<16xf32>
    %43 = vector.multi_reduction <maximumf>, %42, %cst_18 [1] : vector<16x16xf32> to vector<16xf32>
    %44 = vector.shape_cast %43 : vector<16xf32> to vector<16x1xf32>
    %45 = vector.broadcast %44 : vector<16x1xf32> to vector<16x16xf32>
    %46 = arith.subf %42, %45 : vector<16x16xf32>
    %47 = math.exp %46 : vector<16x16xf32>
    %cst_19 = arith.constant dense<0.000000e+00> : vector<16xf32>
    %48 = vector.multi_reduction <add>, %47, %cst_19 [1] : vector<16x16xf32> to vector<16xf32>
    %49 = vector.shape_cast %48 : vector<16xf32> to vector<16x1xf32>
    %50 = tpu.reciprocal %49 {approx = true} : vector<16x1xf32> -> vector<16x1xf32>
    %51 = vector.broadcast %50 : vector<16x1xf32> to vector<16x16xf32>
    %52 = arith.mulf %47, %51 : vector<16x16xf32>
    %53 = vector.extract_strided_slice %7 {offsets = [0, 16], sizes = [16, 8], strides = [1, 1]} : vector<16x32xbf16> to vector<16x8xbf16>
    %54 = arith.truncf %52 : vector<16x16xf32> to vector<16x16xbf16>
    %cst_20 = arith.constant dense<0.000000e+00> : vector<16x8xf32>
    %55 = tpu.matmul %54, %53, %cst_20 {dimension_numbers = #tpu.dot_dimension_numbers<[1], [0], [0], [1], [0, 0, 1, 1], [], []>} : vector<16x16xbf16>, vector<16x8xbf16>, vector<16x8xf32> -> vector<16x8xf32>
    %c3 = arith.constant 3 : index
    %c0_21 = arith.constant 0 : index
    %c0_22 = arith.constant 0 : index
    %56 = vector.load %arg5[%c3, %c0_21, %c0_22] : memref<4x16x16xbf16, #tpu.memory_space<vmem>>, vector<1x16x16xbf16>
    %57 = vector.shape_cast %56 : vector<1x16x16xbf16> to vector<16x16xbf16>
    %58 = arith.extf %57 : vector<16x16xbf16> to vector<16x16xf32>
    %cst_23 = arith.constant dense<0xFF800000> : vector<16xf32>
    %59 = vector.multi_reduction <maximumf>, %58, %cst_23 [1] : vector<16x16xf32> to vector<16xf32>
    %60 = vector.shape_cast %59 : vector<16xf32> to vector<16x1xf32>
    %61 = vector.broadcast %60 : vector<16x1xf32> to vector<16x16xf32>
    %62 = arith.subf %58, %61 : vector<16x16xf32>
    %63 = math.exp %62 : vector<16x16xf32>
    %cst_24 = arith.constant dense<0.000000e+00> : vector<16xf32>
    %64 = vector.multi_reduction <add>, %63, %cst_24 [1] : vector<16x16xf32> to vector<16xf32>
    %65 = vector.shape_cast %64 : vector<16xf32> to vector<16x1xf32>
    %66 = tpu.reciprocal %65 {approx = true} : vector<16x1xf32> -> vector<16x1xf32>
    %67 = vector.broadcast %66 : vector<16x1xf32> to vector<16x16xf32>
    %68 = arith.mulf %63, %67 : vector<16x16xf32>
    %69 = vector.extract_strided_slice %7 {offsets = [0, 24], sizes = [16, 8], strides = [1, 1]} : vector<16x32xbf16> to vector<16x8xbf16>
    %70 = arith.truncf %68 : vector<16x16xf32> to vector<16x16xbf16>
    %cst_25 = arith.constant dense<0.000000e+00> : vector<16x8xf32>
    %71 = tpu.matmul %70, %69, %cst_25 {dimension_numbers = #tpu.dot_dimension_numbers<[1], [0], [0], [1], [0, 0, 1, 1], [], []>} : vector<16x16xbf16>, vector<16x8xbf16>, vector<16x8xf32> -> vector<16x8xf32>
    %72 = tpu.concatenate %23, %39, %55, %71 in 1 : vector<16x8xf32>, vector<16x8xf32>, vector<16x8xf32>, vector<16x8xf32> -> vector<16x32xf32>
    %c0_26 = arith.constant 0 : index
    %c0_27 = arith.constant 0 : index
    %73 = vector.load %arg1[%c0_26, %c0_27] : memref<16x32xf32, #tpu.memory_space<vmem>>, vector<16x32xf32>
    %74 = arith.addf %73, %72 : vector<16x32xf32>
    %c0_28 = arith.constant 0 : index
    %c0_29 = arith.constant 0 : index
    %75 = vector.load %arg6[%c0_28, %c0_29] : memref<1x32xf32, #tpu.memory_space<vmem>>, vector<1x32xf32>
    %76 = vector.broadcast %75 : vector<1x32xf32> to vector<16x32xf32>
    %77 = arith.addf %74, %76 : vector<16x32xf32>
    %c0_30 = arith.constant 0 : index
    %c0_31 = arith.constant 0 : index
    %78 = vector.load %arg7[%c0_30, %c0_31] : memref<32x32xbf16, #tpu.memory_space<vmem>>, vector<32x32xbf16>
    %79 = arith.truncf %77 : vector<16x32xf32> to vector<16x32xbf16>
    %cst_32 = arith.constant dense<0.000000e+00> : vector<16x32xf32>
    %80 = tpu.matmul %79, %78, %cst_32 {dimension_numbers = #tpu.dot_dimension_numbers<[1], [0], [0], [1], [0, 0, 1, 1], [], []>} : vector<16x32xbf16>, vector<32x32xbf16>, vector<16x32xf32> -> vector<16x32xf32>
    %c0_33 = arith.constant 0 : index
    %c0_34 = arith.constant 0 : index
    %81 = vector.load %arg8[%c0_33, %c0_34] : memref<1x32xf32, #tpu.memory_space<vmem>>, vector<1x32xf32>
    %82 = vector.broadcast %81 : vector<1x32xf32> to vector<16x32xf32>
    %83 = arith.addf %80, %82 : vector<16x32xf32>
    %cst_35 = arith.constant 5.000000e-01 : f32
    %84 = vector.broadcast %cst_35 : f32 to vector<16x32xf32>
    %85 = arith.mulf %84, %83 : vector<16x32xf32>
    %cst_36 = arith.constant 0.707106769 : f32
    %86 = vector.broadcast %cst_36 : f32 to vector<16x32xf32>
    %87 = arith.mulf %83, %86 : vector<16x32xf32>
    %88 = math.erf %87 : vector<16x32xf32>
    %cst_37 = arith.constant 1.000000e+00 : f32
    %89 = vector.broadcast %cst_37 : f32 to vector<16x32xf32>
    %90 = arith.addf %89, %88 : vector<16x32xf32>
    %91 = arith.mulf %85, %90 : vector<16x32xf32>
    %92 = arith.addf %77, %91 : vector<16x32xf32>
    %c0_38 = arith.constant 0 : index
    %c0_39 = arith.constant 0 : index
    %93 = vector.load %arg9[%c0_38, %c0_39] : memref<16x32xf32, #tpu.memory_space<vmem>>, vector<16x32xf32>
    tpu.vector_store %arg9[%c0_38, %c0_39], %92 {strides = array<i32>} : memref<16x32xf32, #tpu.memory_space<vmem>>, vector<16x32xf32>,
    return
  }
  func.func @transform_0(%arg0: i32) -> (i32, i32) {
    %c0_i32 = arith.constant 0 : i32
    %c0_i32_0 = arith.constant 0 : i32
    return %arg0, %c0_i32 : i32, i32
  }
  func.func @transform_1(%arg0: i32) -> (i32, i32) {
    %c0_i32 = arith.constant 0 : i32
    %c0_i32_0 = arith.constant 0 : i32
    %c0_i32_1 = arith.constant 0 : i32
    return %c0_i32, %c0_i32_0 : i32, i32
  }
  func.func @transform_2(%arg0: i32) -> (i32, i32) {
    %c0_i32 = arith.constant 0 : i32
    %c0_i32_0 = arith.constant 0 : i32
    %c0_i32_1 = arith.constant 0 : i32
    return %c0_i32, %c0_i32_0 : i32, i32
  }
  func.func @transform_3(%arg0: i32) -> (i32, i32) {
    %c0_i32 = arith.constant 0 : i32
    %c0_i32_0 = arith.constant 0 : i32
    %c0_i32_1 = arith.constant 0 : i32
    return %c0_i32, %c0_i32_0 : i32, i32
  }
  func.func @transform_4(%arg0: i32) -> (i32, i32, i32) {
    %c0_i32 = arith.constant 0 : i32
    %c0_i32_0 = arith.constant 0 : i32
    %c0_i32_1 = arith.constant 0 : i32
    return %c0_i32, %arg0, %c0_i32_0 : i32, i32, i32
  }
  func.func @transform_5(%arg0: i32) -> (i32, i32) {
    %c0_i32 = arith.constant 0 : i32
    %c0_i32_0 = arith.constant 0 : i32
    %c0_i32_1 = arith.constant 0 : i32
    return %c0_i32, %c0_i32_0 : i32, i32
  }
  func.func @transform_6(%arg0: i32) -> (i32, i32) {
    %c0_i32 = arith.constant 0 : i32
    %c0_i32_0 = arith.constant 0 : i32
    %c0_i32_1 = arith.constant 0 : i32
    return %c0_i32, %c0_i32_0 : i32, i32
  }
  func.func @transform_7(%arg0: i32) -> (i32, i32) {
    %c0_i32 = arith.constant 0 : i32
    %c0_i32_0 = arith.constant 0 : i32
    %c0_i32_1 = arith.constant 0 : i32
    return %c0_i32, %c0_i32_0 : i32, i32
  }
  func.func @transform_8(%arg0: i32) -> (i32, i32) {
    %c0_i32 = arith.constant 0 : i32
    %c0_i32_0 = arith.constant 0 : i32
    return %arg0, %c0_i32 : i32, i32
  }
}

module attributes {stable_mosaic.version = 11 : i64} {
  func.func @_mlp_kernel(%arg0: i32, %arg1: memref<16x32xf32, #tpu.memory_space<vmem>>, %arg2: memref<32x32xbf16, #tpu.memory_space<vmem>>, %arg3: memref<1x32xf32, #tpu.memory_space<vmem>>, %arg4: memref<32x16xbf16, #tpu.memory_space<vmem>>, %arg5: memref<1x16xf32, #tpu.memory_space<vmem>>, %arg6: memref<16x16xf32, #tpu.memory_space<vmem>>) attributes {dimension_semantics = [#tpu.dimension_semantics<parallel>], iteration_bounds = array<i64: 1>, scalar_prefetch = 0 : i64, scratch_operands = 0 : i64, tpu.core_type = #tpu.core_type<tc>, window_params = [{transform_indices = @transform_0, window_bounds = array<i64: 16, 32>}, {pipeline_mode = #tpu.pipeline_mode<synchronous>, transform_indices = @transform_1, window_bounds = array<i64: 32, 32>}, {pipeline_mode = #tpu.pipeline_mode<synchronous>, transform_indices = @transform_2, window_bounds = array<i64: 1, 32>}, {pipeline_mode = #tpu.pipeline_mode<synchronous>, transform_indices = @transform_3, window_bounds = array<i64: 32, 16>}, {pipeline_mode = #tpu.pipeline_mode<synchronous>, transform_indices = @transform_4, window_bounds = array<i64: 1, 16>}, {transform_indices = @transform_5, window_bounds = array<i64: 16, 16>}]} {
    %c0 = arith.constant 0 : index
    %c0_0 = arith.constant 0 : index
    %0 = vector.load %arg1[%c0, %c0_0] : memref<16x32xf32, #tpu.memory_space<vmem>>, vector<16x32xf32>
    %c0_1 = arith.constant 0 : index
    %c0_2 = arith.constant 0 : index
    %1 = vector.load %arg2[%c0_1, %c0_2] : memref<32x32xbf16, #tpu.memory_space<vmem>>, vector<32x32xbf16>
    %2 = arith.truncf %0 : vector<16x32xf32> to vector<16x32xbf16>
    %cst = arith.constant dense<0.000000e+00> : vector<16x32xf32>
    %3 = tpu.matmul %2, %1, %cst {dimension_numbers = #tpu.dot_dimension_numbers<[1], [0], [0], [1], [0, 0, 1, 1], [], []>} : vector<16x32xbf16>, vector<32x32xbf16>, vector<16x32xf32> -> vector<16x32xf32>
    %c0_3 = arith.constant 0 : index
    %c0_4 = arith.constant 0 : index
    %4 = vector.load %arg3[%c0_3, %c0_4] : memref<1x32xf32, #tpu.memory_space<vmem>>, vector<1x32xf32>
    %5 = vector.broadcast %4 : vector<1x32xf32> to vector<16x32xf32>
    %6 = arith.addf %3, %5 : vector<16x32xf32>
    %cst_5 = arith.constant 0.000000e+00 : f32
    %7 = vector.broadcast %cst_5 : f32 to vector<16x32xf32>
    %8 = arith.cmpf ogt, %6, %7 : vector<16x32xf32>
    %cst_6 = arith.constant 2.000000e-02 : f32
    %9 = vector.broadcast %cst_6 : f32 to vector<16x32xf32>
    %10 = arith.mulf %9, %6 : vector<16x32xf32>
    %11 = arith.select %8, %6, %10 : vector<16x32xi1>, vector<16x32xf32>
    %c0_7 = arith.constant 0 : index
    %c0_8 = arith.constant 0 : index
    %12 = vector.load %arg4[%c0_7, %c0_8] : memref<32x16xbf16, #tpu.memory_space<vmem>>, vector<32x16xbf16>
    %13 = arith.truncf %11 : vector<16x32xf32> to vector<16x32xbf16>
    %cst_9 = arith.constant dense<0.000000e+00> : vector<16x16xf32>
    %14 = tpu.matmul %13, %12, %cst_9 {dimension_numbers = #tpu.dot_dimension_numbers<[1], [0], [0], [1], [0, 0, 1, 1], [], []>} : vector<16x32xbf16>, vector<32x16xbf16>, vector<16x16xf32> -> vector<16x16xf32>
    %c0_10 = arith.constant 0 : index
    %c0_11 = arith.constant 0 : index
    %15 = vector.load %arg5[%c0_10, %c0_11] : memref<1x16xf32, #tpu.memory_space<vmem>>, vector<1x16xf32>
    %16 = vector.broadcast %15 : vector<1x16xf32> to vector<16x16xf32>
    %17 = arith.addf %14, %16 : vector<16x16xf32>
    %c0_12 = arith.constant 0 : index
    %c0_13 = arith.constant 0 : index
    %18 = vector.load %arg6[%c0_12, %c0_13] : memref<16x16xf32, #tpu.memory_space<vmem>>, vector<16x16xf32>
    tpu.vector_store %arg6[%c0_12, %c0_13], %17 {strides = array<i32>} : memref<16x16xf32, #tpu.memory_space<vmem>>, vector<16x16xf32>,
    return
  }
  func.func @transform_0(%arg0: i32) -> (i32, i32) {
    %c0_i32 = arith.constant 0 : i32
    %c0_i32_0 = arith.constant 0 : i32
    return %arg0, %c0_i32 : i32, i32
  }
  func.func @transform_1(%arg0: i32) -> (i32, i32) {
    %c0_i32 = arith.constant 0 : i32
    %c0_i32_0 = arith.constant 0 : i32
    %c0_i32_1 = arith.constant 0 : i32
    return %c0_i32, %c0_i32_0 : i32, i32
  }
  func.func @transform_2(%arg0: i32) -> (i32, i32) {
    %c0_i32 = arith.constant 0 : i32
    %c0_i32_0 = arith.constant 0 : i32
    %c0_i32_1 = arith.constant 0 : i32
    return %c0_i32, %c0_i32_0 : i32, i32
  }
  func.func @transform_3(%arg0: i32) -> (i32, i32) {
    %c0_i32 = arith.constant 0 : i32
    %c0_i32_0 = arith.constant 0 : i32
    %c0_i32_1 = arith.constant 0 : i32
    return %c0_i32, %c0_i32_0 : i32, i32
  }
  func.func @transform_4(%arg0: i32) -> (i32, i32) {
    %c0_i32 = arith.constant 0 : i32
    %c0_i32_0 = arith.constant 0 : i32
    %c0_i32_1 = arith.constant 0 : i32
    return %c0_i32, %c0_i32_0 : i32, i32
  }
  func.func @transform_5(%arg0: i32) -> (i32, i32) {
    %c0_i32 = arith.constant 0 : i32
    %c0_i32_0 = arith.constant 0 : i32
    return %arg0, %c0_i32 : i32, i32
  }
}

</mosaic_0001>

<bundles_post_ra>
// kernel: graph_encoder.6
= control target key start
LH: loop header
LB: loop body
LE: loop exit
PB: predicated region body
PF: predicated region fallthrough
CT: control target
= control target key end

     0   :  { %10 = vsyncpa [#allocation3], 0  ;;  %s468_s0 = inlined_call_operand.hbm [shape: f32[16,8], index: 0, kind: input, shape index: {}]   ;;  %s469_s1 = inlined_call_operand.hbm [shape: bf16[8,32], index: 1, kind: input, shape index: {}]   ;;  %s470_s2 = inlined_call_operand.hbm [shape: f32[1,32], index: 2, kind: input, shape index: {}]   ;;  %s471_s3 = inlined_call_operand.hbm [shape: f32[1,32], index: 3, kind: input, shape index: {}]   ;;  %s472_s4 = inlined_call_operand.hbm [shape: f32[1,32], index: 4, kind: input, shape index: {}]   ;;  %s473_s5 = inlined_call_operand.hbm [shape: f32[16,32], index: 5, kind: output, shape index: {}]  }
   0x1   :  { %11 = vsyncpa [#allocation6], 0 }
   0x2   :  { %12 = vsyncpa [#allocation9], 0 }
   0x3   :  { %13 = vsyncpa [#allocation4], 0  ;;  %s350_s18 = smov [#allocation5]   ;;  %s351_s20 = smov [#allocation8]  }
   0x4   :  { %s32_s19 = sshll.u32 %s350_s18, 4  ;;  %s52_s21 = sshll.u32 %s351_s20, 4  ;;  %s33_s19 = int_to_ptr.vmem [resolvable:$true] %s32_s19  ;;  %s53_s21 = int_to_ptr.vmem [resolvable:$true] %s52_s21 }
   0x5   :  { %s210_s24 = scalar_lea.hbm %s469_s1, 64 }
   0x6   :  { %p211_p0 = scmp.ne.s32.totalorder %s469_s1, %s210_s24  ;;  %p214_p1 = scmp.lt.u32.totalorder %s210_s24, %s469_s1 }
   0x8   :  { %p216_p2 = pnand %p214_p1, %p211_p0 }
   0xa   :  { %219 = shalt.err (!%p216_p2)
}
   0xb   :  { %s220_s29 = scalar_lea.vmem %s33_s19, 64  ;;  %p225_p4 = scmp.lt.s32.totalorder %s33_s19, %s33_s19 }
   0xc   :  { %p221_p3 = scmp.ne.s32.totalorder %s33_s19, %s220_s29  ;;  %p226_p5 = scmp.lt.s32.totalorder %s220_s29, %s220_s29 }
   0xe   :  { %p227_p6 = por %p226_p5, %p225_p4 }
  0x10   :  { %p228_p7 = pnand %p227_p6, %p221_p3 }
  0x12   :  { %231 = shalt.err (!%p228_p7)
}
  0x13   :  { %35 = dma.hbm_to_vmem [thread:$0]  %s469_s1, 64, %s33_s19, [#allocation6]  }
  0x14   :  { %s232_s9 = scalar_lea.hbm %s471_s3, 16 }
  0x15   :  { %p233_p8 = scmp.ne.s32.totalorder %s471_s3, %s232_s9  ;;  %p236_p9 = scmp.lt.u32.totalorder %s232_s9, %s471_s3 }
  0x17   :  { %p238_p10 = pnand %p236_p9, %p233_p8 }
  0x19   :  { %241 = shalt.err (!%p238_p10)
}
  0x1a   :  { %s242_s14 = scalar_lea.vmem %s53_s21, 16  ;;  %s246_s15 = scalar_lea.vmem %s53_s21, 32 }
  0x1b   :  { %p243_p11 = scmp.ne.s32.totalorder %s53_s21, %s242_s14  ;;  %p247_p12 = scmp.lt.s32.totalorder %s53_s21, %s53_s21 }
  0x1c   :  { %p248_p13 = scmp.lt.s32.totalorder %s246_s15, %s242_s14 }
  0x1e   :  { %p249_p0 = por %p248_p13, %p247_p12 }
  0x20   :  { %p250_p1 = pnand %p249_p0, %p243_p11 }
  0x22   :  { %253 = shalt.err (!%p250_p1)
}
  0x23   :  { %55 = dma.hbm_to_vmem [thread:$0]  %s471_s3, 16, %s53_s21, [#allocation9]  }
  0x24   :  { %s352_s17 = smov [#allocation2]   ;;  %s254_s22 = scalar_lea.hbm %s468_s0, 256 }
  0x25   :  { %s19_s18 = sshll.u32 %s352_s17, 4  ;;  %p255_p2 = scmp.ne.s32.totalorder %s468_s0, %s254_s22  ;;  %s20_s18 = int_to_ptr.vmem [resolvable:$true] %s19_s18 }
  0x26   :  { %p258_p3 = scmp.lt.u32.totalorder %s254_s22, %s468_s0 }
  0x28   :  { %p260_p4 = pnand %p258_p3, %p255_p2 }
  0x2a   :  { %263 = shalt.err (!%p260_p4)
}
  0x2b   :  { %s264_s27 = scalar_lea.vmem %s20_s18, 256  ;;  %p269_p6 = scmp.lt.s32.totalorder %s20_s18, %s20_s18 }
  0x2c   :  { %p265_p5 = scmp.ne.s32.totalorder %s20_s18, %s264_s27  ;;  %p270_p7 = scmp.lt.s32.totalorder %s264_s27, %s264_s27 }
  0x2e   :  { %p271_p8 = por %p270_p7, %p269_p6 }
  0x30   :  { %p272_p9 = pnand %p271_p8, %p265_p5 }
  0x32   :  { %275 = shalt.err (!%p272_p9)
}
  0x33   :  { %s353_s3 = smov 128   ;;  %s354_s21 = smov 8  }
  0x34   :  { %25 = dma.hbm_to_vmem [thread:$0]  %s468_s0, 256, %s20_s18, [#allocation3], %s353_s3, %s353_s3, %s354_s21  }
  0x35   :  { %s355_s30 = smov [#allocation7]   ;;  %s356_s7 = smov [#allocation10]  }
  0x36   :  { %s42_s6 = sshll.u32 %s355_s30, 4  ;;  %s62_s8 = sshll.u32 %s356_s7, 4  ;;  %s43_s6 = int_to_ptr.vmem [resolvable:$true] %s42_s6  ;;  %s63_s8 = int_to_ptr.vmem [resolvable:$true] %s62_s8 }
  0x37   :  { %s276_s11 = scalar_lea.hbm %s470_s2, 16 }
  0x38   :  { %p277_p10 = scmp.ne.s32.totalorder %s470_s2, %s276_s11  ;;  %p280_p11 = scmp.lt.u32.totalorder %s276_s11, %s470_s2 }
  0x3a   :  { %p282_p12 = pnand %p280_p11, %p277_p10 }
  0x3c   :  { %285 = shalt.err (!%p282_p12)
}
  0x3d   :  { %s286_s0 = scalar_lea.vmem %s43_s6, 16  ;;  %s290_s1 = scalar_lea.vmem %s43_s6, 32 }
  0x3e   :  { %p287_p13 = scmp.ne.s32.totalorder %s43_s6, %s286_s0  ;;  %p291_p0 = scmp.lt.s32.totalorder %s43_s6, %s43_s6 }
  0x3f   :  { %p292_p1 = scmp.lt.s32.totalorder %s290_s1, %s286_s0 }
  0x41   :  { %p293_p2 = por %p292_p1, %p291_p0 }
  0x43   :  { %p294_p3 = pnand %p293_p2, %p287_p13 }
  0x45   :  { %297 = shalt.err (!%p294_p3)
}
  0x46   :  { %45 = dma.hbm_to_vmem [thread:$0]  %s470_s2, 16, %s43_s6, [#allocation6]  }
  0x47   :  { %s298_s20 = scalar_lea.hbm %s472_s4, 16 }
  0x48   :  { %p299_p4 = scmp.ne.s32.totalorder %s472_s4, %s298_s20  ;;  %p302_p5 = scmp.lt.u32.totalorder %s298_s20, %s472_s4 }
  0x4a   :  { %p304_p6 = pnand %p302_p5, %p299_p4 }
  0x4c   :  { %307 = shalt.err (!%p304_p6)
}
  0x4d   :  { %s308_s26 = scalar_lea.vmem %s63_s8, 16  ;;  %s312_s27 = scalar_lea.vmem %s63_s8, 32 }
  0x4e   :  { %p309_p7 = scmp.ne.s32.totalorder %s63_s8, %s308_s26  ;;  %p313_p8 = scmp.lt.s32.totalorder %s63_s8, %s63_s8 }
  0x4f   :  { %p314_p9 = scmp.lt.s32.totalorder %s312_s27, %s308_s26 }
  0x51   :  { %p315_p10 = por %p314_p9, %p313_p8 }
  0x53   :  { %p316_p11 = pnand %p315_p10, %p309_p7 }
  0x55   :  { %319 = shalt.err (!%p316_p11)
}
  0x56   :  { %65 = dma.hbm_to_vmem [thread:$0]  %s472_s4, 16, %s63_s8, [#allocation9]  }
  0x57   :  { %342 = dma.done.wait [#allocation3], 256  }
  0x58   :  { %343 = vsyncadd [#allocation3], 4294967040 }
  0x59   :  { %344 = dma.done.wait [#allocation6], 80  }
  0x5a   :  { %345 = vsyncadd [#allocation6], 4294967216 }
  0x5b   :  { %346 = dma.done.wait [#allocation9], 32  }
  0x5c   :  { %347 = vsyncadd [#allocation9], 4294967264  ;;  %v357_v0 = vmov 0.0   ;;  %vm358_vm0 = vmmov 0   ;;  %vm97_vm1 = vcmask 1043456   ;;  %v82_v2 = vld [vmem:[#allocation2] sm:$0xff] }
  0x5d   :  { %194 = vmatprep.subr.bf16.mxu0 %v357_v0  ;;  %196 = vmatprep.mubr.msk.bf16.mxu0 %vm358_vm0, %v357_v0  ;;  %v84_v1 = vld [vmem:[#allocation5] sm:$0xf]  ;;  %v83_v3 = vld [vmem:[#allocation2 + $0x8] sm:$0xff]  ;;  %vm93_vm2 = vcmask 64512   ;;  %v188_v6 = vld [vmem:[#allocation7] ss:$0 sm:$0xff] }
  0x5e   :  { %v99_v4 = vsel %vm97_vm1, %v84_v1, 0  ;;  %v85_v5 = vpack.c.bf16 %v83_v3, %v82_v2  ;;  %v190_v12 = vld [vmem:[#allocation8] ss:$0 sm:$0xff]  ;;  %v191_v17 = vld [vmem:[#allocation10] ss:$0 sm:$0xff]  ;;  %vm166_vm5 = vcmask 261120  }
  0x5f   :  { %195 = vmatpush3.bf16.msra.mxu0 %v99_v4  ;;  %s359_s4 = smov [#allocation11]  }
  0x60   :  { %s174_s29 = sshll.u32 %s359_s4, 4  ;;  %s175_s29 = int_to_ptr.vmem [resolvable:$true] %s174_s29 }
  0x61   :  { %s320_s30 = scalar_lea.vmem %s175_s29, 256  ;;  %p325_p13 = scmp.lt.s32.totalorder %s175_s29, %s175_s29 }
  0x62   :  { %197 = vmatmul.mubr.msk.bf16.vlgmr.msra.gmra.mrb[0].mxu0 %vm93_vm2, %v85_v5  ;;  %p321_p12 = scmp.ne.s32.totalorder %s175_s29, %s320_s30  ;;  %p326_p0 = scmp.lt.s32.totalorder %s320_s30, %s320_s30 }
  0x64   :  { %p327_p1 = por %p326_p0, %p325_p13 }
  0x66   :  { %p328_p2 = pnand %p327_p1, %p321_p12 }
 0x135   :  { %v135_v7 = vpop.f32.mrb[0].mxu0 }
 0x136   :  { %v136_v8 = vadd.f32 %v188_v6, %v135_v7  ;;  %v198_v9 = vpop.f32.mrb[1].mxu0 }
 0x137   :  { %v138_v10 = vpop.f32.mrb[2].mxu0 }
 0x138   :  { %vm142_vm3 = vcmp.gt.f32.partialorder %v136_v8, 0.0  ;;  %v144_v11 = vmul.f32 0.02, %v136_v8  ;;  %v139_v13 = vadd.f32 %v188_v6, %v138_v10  ;;  %v199_v14 = vpop.f32.mrb[3].mxu0 }
 0x13a   :  { %v146_v15 = vsel %vm142_vm3, %v136_v8, %v144_v11  ;;  %vm143_vm4 = vcmp.gt.f32.partialorder %v139_v13, 0.0  ;;  %v145_v16 = vmul.f32 0.02, %v139_v13 }
 0x13b   :  { %v155_v18 = vmul.f32 %v190_v12, %v146_v15 }
 0x13c   :  { %v147_v19 = vsel %vm143_vm4, %v139_v13, %v145_v16 }
 0x13d   :  { %v156_v20 = vmul.f32 %v190_v12, %v147_v19  ;;  %v164_v21 = vadd.f32 %v191_v17, %v155_v18 }
 0x13f   :  { %v165_v22 = vadd.f32 %v191_v17, %v156_v20  ;;  %167 = vst.msk [vmem:[#allocation11] sm:$0xff] %vm166_vm5, %v164_v21 }
 0x141   :  { %168 = vst.msk [vmem:[#allocation11 + $0x8] sm:$0xff] %vm166_vm5, %v165_v22 }
 0x142   :  { %331 = shalt.err (!%p328_p2)
}
 0x143   :  { %s332_s8 = scalar_lea.hbm %s473_s5, 256 }
 0x144   :  { %p333_p3 = scmp.ne.s32.totalorder %s473_s5, %s332_s8  ;;  %p336_p4 = scmp.lt.u32.totalorder %s332_s8, %s473_s5 }
 0x146   :  { %p338_p5 = pnand %p336_p4, %p333_p3 }
 0x148   :  { %341 = shalt.err (!%p338_p5)
}
 0x149   :  { %180 = dma.vmem_to_hbm [thread:$0]  %s175_s29, 256, %s473_s5, [#allocation4], %s353_s3, %s353_s3, %s354_s21  }
 0x14a   :  { %348 = dma.done.wait [#allocation4], 256  }
 0x14b   :  { %349 = vsyncadd [#allocation4], 4294967040 }
 0x14c   :  { %184 = vsyncpa [#allocation3], 1 }
 0x14d   :  { %185 = vsyncpa [#allocation6], 1 }
 0x14e   :  { %186 = vsyncpa [#allocation9], 1 }
 0x14f   :  { %187 = vsyncpa [#allocation4], 1 }

// kernel: graph_encoder.7
= control target key start
LH: loop header
LB: loop body
LE: loop exit
PB: predicated region body
PF: predicated region fallthrough
CT: control target
= control target key end

     0   :  { %14 = vsyncpa [#allocation3], 0  ;;  %s1144_s0 = inlined_call_operand.hbm [shape: f32[40,32], index: 0, kind: input, shape index: {}]   ;;  %s1145_s1 = inlined_call_operand.hbm [shape: f32[40,32], index: 1, kind: input, shape index: {}]   ;;  %s1146_s2 = inlined_call_operand.hbm [shape: f32[40,8], index: 2, kind: input, shape index: {}]   ;;  %s1147_s3 = inlined_call_operand.hbm [shape: bf16[32,32], index: 3, kind: input, shape index: {}]   ;;  %s1148_s4 = inlined_call_operand.hbm [shape: f32[1,32], index: 4, kind: input, shape index: {}]   ;;  %s1149_s5 = inlined_call_operand.hbm [shape: bf16[32,32], index: 5, kind: input, shape index: {}]   ;;  %s1150_s6 = inlined_call_operand.hbm [shape: f32[1,32], index: 6, kind: input, shape index: {}]   ;;  %s1151_s7 = inlined_call_operand.hbm [shape: bf16[8,32], index: 7, kind: input, shape index: {}]   ;;  %s1152_s8 = inlined_call_operand.hbm [shape: bf16[4,32], index: 8, kind: input, shape index: {}]   ;;  %s1153_s9 = inlined_call_operand.hbm [shape: bf16[4,40], index: 9, kind: output, shape index: {}]  }
   0x1   :  { %15 = vsyncpa [#allocation6], 0 }
   0x2   :  { %16 = vsyncpa [#allocation9], 0 }
   0x3   :  { %17 = vsyncpa [#allocation12], 0 }
   0x4   :  { %18 = vsyncpa [#allocation15], 0 }
   0x5   :  { %19 = vsyncpa [#allocation4], 0  ;;  %s897_s30 = smov [#allocation5]   ;;  %s898_s11 = smov [#allocation8]  }
   0x6   :  { %s37_s10 = sshll.u32 %s897_s30, 4  ;;  %s61_s12 = sshll.u32 %s898_s11, 4  ;;  %s38_s10 = int_to_ptr.vmem [resolvable:$true] %s37_s10  ;;  %s963_s12 = int_to_ptr.vmem [resolvable:$true] %s61_s12 }
   0x7   :  { %s665_s15 = scalar_lea.hbm %s1145_s1, 640 }
   0x8   :  { %p666_p0 = scmp.ne.s32.totalorder %s1145_s1, %s665_s15  ;;  %p669_p1 = scmp.lt.u32.totalorder %s665_s15, %s1145_s1 }
   0xa   :  { %p671_p2 = pnand %p669_p1, %p666_p0 }
   0xc   :  { %674 = shalt.err (!%p671_p2)
}
   0xd   :  { %s675_s20 = scalar_lea.vmem %s38_s10, 640  ;;  %p680_p4 = scmp.lt.s32.totalorder %s38_s10, %s38_s10 }
   0xe   :  { %p676_p3 = scmp.ne.s32.totalorder %s38_s10, %s675_s20  ;;  %p681_p5 = scmp.lt.s32.totalorder %s675_s20, %s675_s20 }
  0x10   :  { %p682_p6 = por %p681_p5, %p680_p4 }
  0x12   :  { %p683_p7 = pnand %p682_p6, %p676_p3 }
  0x14   :  { %686 = shalt.err (!%p683_p7)
}
  0x15   :  { %s899_s21 = smov 128   ;;  %s900_s22 = smov 8  }
  0x16   :  { %43 = dma.hbm_to_vmem [thread:$0]  %s1145_s1, 640, %s38_s10, [#allocation6], %s899_s21, %s899_s21, %s900_s22  }
  0x17   :  { %s687_s27 = scalar_lea.hbm %s1147_s3, 256 }
  0x18   :  { %p688_p8 = scmp.ne.s32.totalorder %s1147_s3, %s687_s27  ;;  %p691_p9 = scmp.lt.u32.totalorder %s687_s27, %s1147_s3 }
  0x1a   :  { %p693_p10 = pnand %p691_p9, %p688_p8 }
  0x1c   :  { %696 = shalt.err (!%p693_p10)
}
  0x1d   :  { %s697_s13 = scalar_lea.vmem %s963_s12, 256  ;;  %p702_p12 = scmp.lt.s32.totalorder %s963_s12, %s963_s12 }
  0x1e   :  { %p698_p11 = scmp.ne.s32.totalorder %s963_s12, %s697_s13  ;;  %p703_p13 = scmp.lt.s32.totalorder %s697_s13, %s697_s13 }
  0x20   :  { %p704_p0 = por %p703_p13, %p702_p12 }
  0x22   :  { %p705_p1 = pnand %p704_p0, %p698_p11 }
  0x24   :  { %708 = shalt.err (!%p705_p1)
}
  0x25   :  { %s901_s1 = smov 64   ;;  %s902_s10 = smov 4  }
  0x26   :  { %67 = dma.hbm_to_vmem [thread:$0]  %s1147_s3, 256, %s963_s12, [#allocation9], %s901_s1, %s901_s1, %s902_s10  }
  0x27   :  { %s903_s16 = smov [#allocation11]   ;;  %s904_s18 = smov [#allocation14]  }
  0x28   :  { %s83_s17 = sshll.u32 %s903_s16, 4  ;;  %s106_s19 = sshll.u32 %s904_s18, 4  ;;  %s84_s17 = int_to_ptr.vmem [resolvable:$true] %s83_s17  ;;  %s107_s19 = int_to_ptr.vmem [resolvable:$true] %s106_s19 }
  0x29   :  { %s709_s24 = scalar_lea.hbm %s1149_s5, 256 }
  0x2a   :  { %p710_p2 = scmp.ne.s32.totalorder %s1149_s5, %s709_s24  ;;  %p713_p3 = scmp.lt.u32.totalorder %s709_s24, %s1149_s5 }
  0x2c   :  { %p715_p4 = pnand %p713_p3, %p710_p2 }
  0x2e   :  { %718 = shalt.err (!%p715_p4)
}
  0x2f   :  { %s719_s3 = scalar_lea.vmem %s84_s17, 256  ;;  %p724_p6 = scmp.lt.s32.totalorder %s84_s17, %s84_s17 }
  0x30   :  { %p720_p5 = scmp.ne.s32.totalorder %s84_s17, %s719_s3  ;;  %p725_p7 = scmp.lt.s32.totalorder %s719_s3, %s719_s3 }
  0x32   :  { %p726_p8 = por %p725_p7, %p724_p6 }
  0x34   :  { %p727_p9 = pnand %p726_p8, %p720_p5 }
  0x36   :  { %730 = shalt.err (!%p727_p9)
}
  0x37   :  { %89 = dma.hbm_to_vmem [thread:$0]  %s1149_s5, 256, %s84_s17, [#allocation12], %s901_s1, %s901_s1, %s902_s10  }
  0x38   :  { %s731_s13 = scalar_lea.hbm %s1151_s7, 64 }
  0x39   :  { %p732_p10 = scmp.ne.s32.totalorder %s1151_s7, %s731_s13  ;;  %p735_p11 = scmp.lt.u32.totalorder %s731_s13, %s1151_s7 }
  0x3b   :  { %p737_p12 = pnand %p735_p11, %p732_p10 }
  0x3d   :  { %740 = shalt.err (!%p737_p12)
}
  0x3e   :  { %s741_s20 = scalar_lea.vmem %s107_s19, 64  ;;  %p746_p0 = scmp.lt.s32.totalorder %s107_s19, %s107_s19 }
  0x3f   :  { %p742_p13 = scmp.ne.s32.totalorder %s107_s19, %s741_s20  ;;  %p747_p1 = scmp.lt.s32.totalorder %s741_s20, %s741_s20 }
  0x41   :  { %p748_p2 = por %p747_p1, %p746_p0 }
  0x43   :  { %p749_p3 = pnand %p748_p2, %p742_p13 }
  0x45   :  { %752 = shalt.err (!%p749_p3)
}
  0x46   :  { %109 = dma.hbm_to_vmem [thread:$0]  %s1151_s7, 64, %s107_s19, [#allocation15]  }
  0x47   :  { %s905_s10 = smov [#allocation2]   ;;  %s906_s23 = smov [#allocation7]  }
  0x48   :  { %s25_s17 = sshll.u32 %s905_s10, 4  ;;  %s49_s24 = sshll.u32 %s906_s23, 4  ;;  %s26_s17 = int_to_ptr.vmem [resolvable:$true] %s25_s17  ;;  %s1021_s24 = int_to_ptr.vmem [resolvable:$true] %s49_s24 }
  0x49   :  { %s753_s27 = scalar_lea.hbm %s1144_s0, 640 }
  0x4a   :  { %p754_p4 = scmp.ne.s32.totalorder %s1144_s0, %s753_s27  ;;  %p757_p5 = scmp.lt.u32.totalorder %s753_s27, %s1144_s0 }
  0x4c   :  { %p759_p6 = pnand %p757_p5, %p754_p4 }
  0x4e   :  { %762 = shalt.err (!%p759_p6)
}
  0x4f   :  { %s763_s7 = scalar_lea.vmem %s26_s17, 640  ;;  %p768_p8 = scmp.lt.s32.totalorder %s26_s17, %s26_s17 }
  0x50   :  { %p764_p7 = scmp.ne.s32.totalorder %s26_s17, %s763_s7  ;;  %p769_p9 = scmp.lt.s32.totalorder %s763_s7, %s763_s7 }
  0x52   :  { %p770_p10 = por %p769_p9, %p768_p8 }
  0x54   :  { %p771_p11 = pnand %p770_p10, %p764_p7 }
  0x56   :  { %774 = shalt.err (!%p771_p11)
}
  0x57   :  { %31 = dma.hbm_to_vmem [thread:$0]  %s1144_s0, 640, %s26_s17, [#allocation3], %s899_s21, %s899_s21, %s900_s22  }
  0x58   :  { %s775_s14 = scalar_lea.hbm %s1146_s2, 640 }
  0x59   :  { %p776_p12 = scmp.ne.s32.totalorder %s1146_s2, %s775_s14  ;;  %p779_p13 = scmp.lt.u32.totalorder %s775_s14, %s1146_s2 }
  0x5b   :  { %p781_p0 = pnand %p779_p13, %p776_p12 }
  0x5d   :  { %784 = shalt.err (!%p781_p0)
}
  0x5e   :  { %s785_s5 = scalar_lea.vmem %s1021_s24, 640  ;;  %p790_p2 = scmp.lt.s32.totalorder %s1021_s24, %s1021_s24 }
  0x5f   :  { %p786_p1 = scmp.ne.s32.totalorder %s1021_s24, %s785_s5  ;;  %p791_p3 = scmp.lt.s32.totalorder %s785_s5, %s785_s5 }
  0x61   :  { %p792_p4 = por %p791_p3, %p790_p2 }
  0x63   :  { %p793_p5 = pnand %p792_p4, %p786_p1 }
  0x65   :  { %796 = shalt.err (!%p793_p5)
}
  0x66   :  { %55 = dma.hbm_to_vmem [thread:$0]  %s1146_s2, 640, %s1021_s24, [#allocation6], %s899_s21, %s899_s21, %s900_s22  }
  0x67   :  { %s907_s10 = smov [#allocation10]   ;;  %s908_s23 = smov [#allocation13]  }
  0x68   :  { %s74_s17 = sshll.u32 %s907_s10, 4  ;;  %s96_s25 = sshll.u32 %s908_s23, 4  ;;  %s75_s17 = int_to_ptr.vmem [resolvable:$true] %s74_s17  ;;  %s97_s25 = int_to_ptr.vmem [resolvable:$true] %s96_s25 }
  0x69   :  { %s797_s28 = scalar_lea.hbm %s1148_s4, 16 }
  0x6a   :  { %p798_p6 = scmp.ne.s32.totalorder %s1148_s4, %s797_s28  ;;  %p801_p7 = scmp.lt.u32.totalorder %s797_s28, %s1148_s4 }
  0x6c   :  { %p803_p8 = pnand %p801_p7, %p798_p6 }
  0x6e   :  { %806 = shalt.err (!%p803_p8)
}
  0x6f   :  { %s807_s2 = scalar_lea.vmem %s75_s17, 16  ;;  %s811_s21 = scalar_lea.vmem %s75_s17, 32 }
  0x70   :  { %p808_p9 = scmp.ne.s32.totalorder %s75_s17, %s807_s2  ;;  %p812_p10 = scmp.lt.s32.totalorder %s75_s17, %s75_s17 }
  0x71   :  { %p813_p11 = scmp.lt.s32.totalorder %s811_s21, %s807_s2 }
  0x73   :  { %p814_p12 = por %p813_p11, %p812_p10 }
  0x75   :  { %p815_p13 = pnand %p814_p12, %p808_p9 }
  0x77   :  { %818 = shalt.err (!%p815_p13)
}
  0x78   :  { %77 = dma.hbm_to_vmem [thread:$0]  %s1148_s4, 16, %s75_s17, [#allocation9]  }
  0x79   :  { %s819_s11 = scalar_lea.hbm %s1150_s6, 16 }
  0x7a   :  { %p820_p0 = scmp.ne.s32.totalorder %s1150_s6, %s819_s11  ;;  %p823_p1 = scmp.lt.u32.totalorder %s819_s11, %s1150_s6 }
  0x7c   :  { %p825_p2 = pnand %p823_p1, %p820_p0 }
  0x7e   :  { %828 = shalt.err (!%p825_p2)
}
  0x7f   :  { %s829_s18 = scalar_lea.vmem %s97_s25, 16  ;;  %s833_s20 = scalar_lea.vmem %s97_s25, 32 }
  0x80   :  { %p830_p3 = scmp.ne.s32.totalorder %s97_s25, %s829_s18  ;;  %p834_p4 = scmp.lt.s32.totalorder %s97_s25, %s97_s25 }
  0x81   :  { %p835_p5 = scmp.lt.s32.totalorder %s833_s20, %s829_s18 }
  0x83   :  { %p836_p6 = por %p835_p5, %p834_p4 }
  0x85   :  { %p837_p7 = pnand %p836_p6, %p830_p3 }
  0x87   :  { %840 = shalt.err (!%p837_p7)
}
  0x88   :  { %99 = dma.hbm_to_vmem [thread:$0]  %s1150_s6, 16, %s97_s25, [#allocation12]  }
  0x89   :  { %s909_s0 = smov [#allocation16]   ;;  %s841_s23 = scalar_lea.hbm %s1152_s8, 32 }
  0x8a   :  { %s116_s1 = sshll.u32 %s909_s0, 4  ;;  %p842_p8 = scmp.ne.s32.totalorder %s1152_s8, %s841_s23  ;;  %s117_s1 = int_to_ptr.vmem [resolvable:$true] %s116_s1 }
  0x8b   :  { %p845_p9 = scmp.lt.u32.totalorder %s841_s23, %s1152_s8 }
  0x8d   :  { %p847_p10 = pnand %p845_p9, %p842_p8 }
  0x8f   :  { %850 = shalt.err (!%p847_p10)
}
  0x90   :  { %s851_s12 = scalar_lea.vmem %s117_s1, 32  ;;  %p856_p12 = scmp.lt.s32.totalorder %s117_s1, %s117_s1 }
  0x91   :  { %p852_p11 = scmp.ne.s32.totalorder %s117_s1, %s851_s12  ;;  %p857_p13 = scmp.lt.s32.totalorder %s851_s12, %s851_s12 }
  0x93   :  { %p858_p0 = por %p857_p13, %p856_p12 }
  0x95   :  { %p859_p1 = pnand %p858_p0, %p852_p11 }
  0x97   :  { %862 = shalt.err (!%p859_p1)
}
  0x98   :  { %119 = dma.hbm_to_vmem [thread:$0]  %s1152_s8, 32, %s117_s1, [#allocation15]  }
  0x99   :  { %885 = dma.done.wait [#allocation3], 640  }
  0x9a   :  { %886 = vsyncadd [#allocation3], 4294966656 }
  0x9b   :  { %887 = dma.done.wait [#allocation6], 1280  }
  0x9c   :  { %888 = vsyncadd [#allocation6], 4294966016 }
  0x9d   :  { %889 = dma.done.wait [#allocation9], 272  }
  0x9e   :  { %890 = vsyncadd [#allocation9], 4294967024 }
  0x9f   :  { %891 = dma.done.wait [#allocation12], 272  }
  0xa0   :  { %892 = vsyncadd [#allocation12], 4294967024 }
  0xa1   :  { %893 = dma.done.wait [#allocation15], 96  }
  0xa2   :  { %894 = vsyncadd [#allocation15], 4294967200  ;;  %v910_v0 = vmov 0.0   ;;  %vm911_vm0 = vmmov 0   ;;  %v661_v1 = vld [vmem:[#allocation11] sm:$0xff]   ;;  %v662_v2 = vld [vmem:[#allocation11 + $0x8] sm:$0xff]  }
  0xa3   :  { %578 = vmatprep.subr.bf16.mxu0 %v910_v0  ;;  %582 = vmatprep.mubr.msk.bf16.mxu0 %vm911_vm0, %v910_v0  ;;  %v245_v3 = vld [vmem:[#allocation5] sm:$0xff]  ;;  %v246_v4 = vld [vmem:[#allocation5 + $0x8] sm:$0xff]  ;;  %v356_v5 = vld [vmem:[#allocation14] sm:$0xf]  ;;  %vm370_vm1 = vcmask 1043456   ;;  %vm179_vm2 = vcmask 261120  }
  0xa4   :  { %562 = vmatprep.subr.bf16.mxu1 %v910_v0  ;;  %566 = vmatprep.mubr.msk.bf16.mxu1 %vm911_vm0, %v910_v0  ;;  %v663_v6 = vld [vmem:[#allocation8] sm:$0xff]   ;;  %v254_v7 = vpack.c.bf16 %v246_v4, %v245_v3  ;;  %v372_v8 = vsel %vm370_vm1, %v356_v5, 0  ;;  %v664_v9 = vld [vmem:[#allocation8 + $0x8] sm:$0xff]   ;;  %v149_v11 = vld [vmem:[#allocation2 + $0x8] sm:$0xff]  ;;  %vm360_vm3 = vcmask 64512   ;;  %s912_s8 = smov [#allocation17]  }
  0xa5   :  { %579 = vmatpush3.bf16.msra.mxu0 %v661_v1  ;;  %563 = vmatpush3.bf16.msra.mxu1 %v663_v6  ;;  %v148_v10 = vld [vmem:[#allocation2] sm:$0xff]  ;;  %v247_v12 = vld [vmem:[#allocation5 + $0x10] sm:$0xff]  ;;  %v150_v16 = vld [vmem:[#allocation2 + $0x10] sm:$0xff]  ;;  %s515_s29 = sshll.u32 %s912_s8, 4  ;;  %vm507_vm9 = vcmask 320512   ;;  %s516_s29 = int_to_ptr.vmem [resolvable:$true] %s515_s29 }
  0xa6   :  { %580 = vmatprep.subr.bf16.mxu0 %v910_v0  ;;  %564 = vmatprep.subr.bf16.mxu1 %v910_v0  ;;  %v248_v13 = vld [vmem:[#allocation5 + $0x18] sm:$0xff]  ;;  %v157_v14 = vpack.c.bf16 %v149_v11, %v148_v10  ;;  %v151_v17 = vld [vmem:[#allocation2 + $0x18] sm:$0xff]  ;;  %v249_v18 = vld [vmem:[#allocation5 + $0x20] sm:$0xff]  ;;  %s863_s7 = scalar_lea.vmem %s516_s29, 32  ;;  %p868_p3 = scmp.lt.s32.totalorder %s516_s29, %s516_s29 }
  0xa7   :  { %v255_v15 = vpack.c.bf16 %v248_v13, %v247_v12  ;;  %v158_v19 = vpack.c.bf16 %v151_v17, %v150_v16  ;;  %v256_v20 = vpack.c.bf16 %v249_v18, %v249_v18  ;;  %v152_v21 = vld [vmem:[#allocation2 + $0x20] sm:$0xff]  ;;  %v351_v22 = vld [vmem:[#allocation7] sm:$0xff]  ;;  %v352_v23 = vld [vmem:[#allocation7 + $0x8] sm:$0xff]  ;;  %p864_p2 = scmp.ne.s32.totalorder %s516_s29, %s863_s7  ;;  %p869_p4 = scmp.lt.s32.totalorder %s863_s7, %s863_s7 }
  0xa8   :  { %v159_v24 = vpack.c.bf16 %v152_v21, %v152_v21  ;;  %v357_v25 = vpack.c.bf16 %v352_v23, %v351_v22  ;;  %v353_v26 = vld [vmem:[#allocation7 + $0x10] sm:$0xff]  ;;  %v354_v27 = vld [vmem:[#allocation7 + $0x18] sm:$0xff]  ;;  %v355_v29 = vld [vmem:[#allocation7 + $0x20] sm:$0xff] }
  0xa9   :  { %581 = vmatpush3.bf16.msra.mxu0 %v662_v2  ;;  %565 = vmatpush3.bf16.msra.mxu1 %v664_v9  ;;  %v358_v28 = vpack.c.bf16 %v354_v27, %v353_v26  ;;  %v359_v30 = vpack.c.bf16 %v355_v29, %v355_v29  ;;  %v528_v36 = vld [vmem:[#allocation10] ss:$0 sm:$0xff]  ;;  %v539_v41 = vld [vmem:[#allocation13] ss:$0 sm:$0xff]  ;;  %p870_p5 = por %p869_p4, %p868_p3 }
  0xaa   :  { %594 = vmatprep.subr.bf16.mxu0 %v910_v0  ;;  %608 = vmatprep.subr.bf16.mxu1 %v910_v0 }
  0xab   :  { %p871_p6 = pnand %p870_p5, %p864_p2 }
  0xac   :  { %583 = vmatmul.mubr.msk.bf16.vlgmr.msra.gmra.mrb[0].mxu0 %vm179_vm2, %v254_v7  ;;  %567 = vmatmul.mubr.msk.bf16.vlgmr.msra.gmra.mrb[0].mxu1 %vm179_vm2, %v157_v14 }
  0xad   :  { %595 = vmatpush3.bf16.msra.mxu0 %v372_v8  ;;  %586 = vmatprep.mubr.msk.bf16.mxu0 %vm911_vm0, %v910_v0 }
  0xae   :  { %570 = vmatprep.mubr.msk.bf16.mxu1 %vm911_vm0, %v910_v0 }
  0xb4   :  { %587 = vmatmul.mubr.msk.bf16.gmra.mrb[4].mxu0 %vm179_vm2, %v255_v15  ;;  %571 = vmatmul.mubr.msk.bf16.gmra.mrb[4].mxu1 %vm179_vm2, %v158_v19 }
  0xb5   :  { %590 = vmatprep.mubr.msk.bf16.mxu0 %vm911_vm0, %v910_v0  ;;  %574 = vmatprep.mubr.msk.bf16.mxu1 %vm911_vm0, %v910_v0 }
  0xbc   :  { %591 = vmatmul.mubr.msk.bf16.gmra.mrb[8].mxu0 %vm179_vm2, %v256_v20  ;;  %575 = vmatmul.mubr.msk.bf16.gmra.mrb[8].mxu1 %vm179_vm2, %v159_v24 }
  0xbd   :  { %596 = vmatprep.mubr.msk.bf16.mxu0 %vm911_vm0, %v910_v0  ;;  %614 = vmatprep.mubr.msk.bf16.mxu1 %vm911_vm0, %v910_v0 }
  0xc4   :  { %597 = vmatmul.mubr.msk.bf16.vlgmr.msra.gmra.mrb[0].mxu0 %vm360_vm3, %v357_v25  ;;  %v450_v25 = vld [vmem:[#allocation16] sm:$0x3] }
  0xc5   :  { %600 = vmatprep.mubr.msk.bf16.mxu0 %vm911_vm0, %v910_v0 }
  0xcc   :  { %601 = vmatmul.mubr.msk.bf16.gmra.mrb[4].mxu0 %vm360_vm3, %v358_v28 }
  0xcd   :  { %604 = vmatprep.mubr.msk.bf16.mxu0 %vm911_vm0, %v910_v0 }
  0xd4   :  { %605 = vmatmul.mubr.msk.bf16.gmra.mrb[8].mxu0 %vm360_vm3, %v359_v30 }
 0x17f   :  { %v223_v31 = vpop.f32.mrb[0].mxu1 }
 0x180   :  { %v568_v32 = vpop.f32.mrb[1].mxu1  ;;  %v224_v40 = vadd.f32 %v528_v36, %v223_v31 }
 0x181   :  { %v226_v33 = vpop.f32.mrb[2].mxu1 }
 0x182   :  { %v569_v34 = vpop.f32.mrb[3].mxu1  ;;  %v227_v42 = vadd.f32 %v528_v36, %v226_v33  ;;  %v619_v43 = vadd.f32 %v539_v41, %v224_v40 }
 0x184   :  { %v622_v52 = vadd.f32 %v539_v41, %v227_v42 }
 0x187   :  { %v231_v35 = vpop.f32.mrb[4].mxu1 }
 0x188   :  { %v572_v37 = vpop.f32.mrb[5].mxu1  ;;  %v232_v50 = vadd.f32 %v528_v36, %v231_v35 }
 0x189   :  { %v234_v38 = vpop.f32.mrb[6].mxu1 }
 0x18a   :  { %v573_v39 = vpop.f32.mrb[7].mxu1  ;;  %v235_v58 = vadd.f32 %v528_v36, %v234_v38  ;;  %v625_v59 = vadd.f32 %v539_v41, %v232_v50 }
 0x18c   :  { %v628_v3 = vadd.f32 %v539_v41, %v235_v58 }
 0x18f   :  { %v239_v44 = vpop.f32.mrb[8].mxu1 }
 0x190   :  { %v576_v45 = vpop.f32.mrb[9].mxu1  ;;  %v240_v4 = vadd.f32 %v528_v36, %v239_v44 }
 0x191   :  { %v242_v46 = vpop.f32.mrb[10].mxu1 }
 0x192   :  { %v577_v48 = vpop.f32.mrb[11].mxu1  ;;  %v631_v11 = vadd.f32 %v539_v41, %v240_v4 }
 0x197   :  { %v408_v47 = vpop.f32.mrb[0].mxu0 }
 0x198   :  { %v620_v49 = vadd.f32 %v619_v43, %v408_v47  ;;  %v598_v51 = vpop.f32.mrb[1].mxu0 }
 0x199   :  { %v411_v53 = vpop.f32.mrb[2].mxu0 }
 0x19a   :  { %v440_v54 = vmul.f32 0.2, %v620_v49  ;;  %v623_v55 = vadd.f32 %v622_v52, %v411_v53  ;;  %v599_v56 = vpop.f32.mrb[3].mxu0  ;;  %vm435_vm4 = vcmp.gt.f32.partialorder %v620_v49, 0.0 }
 0x19c   :  { %vm436_vm5 = vcmp.gt.f32.partialorder %v623_v55, 0.0  ;;  %v441_v57 = vmul.f32 0.2, %v623_v55  ;;  %v445_v60 = vsel %vm435_vm4, %v620_v49, %v440_v54 }
 0x19e   :  { %v446_v61 = vsel %vm436_vm5, %v623_v55, %v441_v57 }
 0x19f   :  { %v416_v62 = vpop.f32.mrb[4].mxu0  ;;  %v451_v63 = vpack.c.bf16 %v446_v61, %v445_v60 }
 0x1a0   :  { %v626_v1 = vadd.f32 %v625_v59, %v416_v62  ;;  %v602_v2 = vpop.f32.mrb[5].mxu0 }
 0x1a1   :  { %v419_v5 = vpop.f32.mrb[6].mxu0  ;;  %v458_v6 = vsel %vm179_vm2, %v451_v63, 0 }
 0x1a2   :  { %v442_v7 = vmul.f32 0.2, %v626_v1  ;;  %v629_v8 = vadd.f32 %v628_v3, %v419_v5  ;;  %v603_v9 = vpop.f32.mrb[7].mxu0  ;;  %609 = vmatpush3.bf16.xpose.msra.mxu1 %v458_v6  ;;  %vm437_vm6 = vcmp.gt.f32.partialorder %v626_v1, 0.0 }
 0x1a3   :  { %610 = vmatprep.subr.bf16.mxu1 %v910_v0 }
 0x1a4   :  { %vm438_vm7 = vcmp.gt.f32.partialorder %v629_v8, 0.0  ;;  %v443_v10 = vmul.f32 0.2, %v629_v8  ;;  %v447_v12 = vsel %vm437_vm6, %v626_v1, %v442_v7 }
 0x1a6   :  { %v448_v13 = vsel %vm438_vm7, %v629_v8, %v443_v10 }
 0x1a7   :  { %v424_v14 = vpop.f32.mrb[8].mxu0  ;;  %v452_v15 = vpack.c.bf16 %v448_v13, %v447_v12 }
 0x1a8   :  { %v632_v16 = vadd.f32 %v631_v11, %v424_v14  ;;  %v606_v17 = vpop.f32.mrb[9].mxu0 }
 0x1a9   :  { %v427_v18 = vpop.f32.mrb[10].mxu0  ;;  %v461_v19 = vsel %vm179_vm2, %v452_v15, 0 }
 0x1aa   :  { %vm439_vm8 = vcmp.gt.f32.partialorder %v632_v16, 0.0  ;;  %v444_v20 = vmul.f32 0.2, %v632_v16  ;;  %v607_v21 = vpop.f32.mrb[11].mxu0  ;;  %611 = vmatpush3.bf16.xpose.msra.mxu1 %v461_v19 }
 0x1ab   :  { %612 = vmatprep.subr.bf16.mxu1 %v910_v0 }
 0x1ac   :  { %v449_v22 = vsel %vm439_vm8, %v632_v16, %v444_v20 }
 0x1ad   :  { %v453_v23 = vpack.c.bf16 %v449_v22, %v449_v22 }
 0x1af   :  { %v464_v24 = vsel %vm179_vm2, %v453_v23, 0 }
 0x1b2   :  { %613 = vmatpush3.bf16.xpose.msra.mxu1 %v464_v24 }
 0x1b9   :  { %615 = vmatmul.mubr.msk.bf16.vlgmr.msra.gmra.mrb[12].mxu1 %vm179_vm2, %v450_v25 }
 0x28c   :  { %v500_v26 = vpop.f32.mrb[12].mxu1 }
 0x28d   :  { %v506_v27 = vpack.c.bf16 %v500_v26, %v500_v26  ;;  %v616_v28 = vpop.f32.mrb[13].mxu1 }
 0x28e   :  { %v503_v29 = vpop.f32.mrb[14].mxu1 }
 0x28f   :  { %v617_v30 = vpop.f32.mrb[15].mxu1  ;;  %508 = vst.msk [vmem:[#allocation17] sm:$0x3] %vm507_vm9, %v506_v27 }
 0x290   :  { %874 = shalt.err (!%p871_p6)
}
 0x291   :  { %s875_s22 = scalar_lea.hbm %s1153_s9, 32 }
 0x292   :  { %p876_p7 = scmp.ne.s32.totalorder %s1153_s9, %s875_s22  ;;  %p879_p8 = scmp.lt.u32.totalorder %s875_s22, %s1153_s9 }
 0x294   :  { %p881_p9 = pnand %p879_p8, %p876_p7 }
 0x296   :  { %884 = shalt.err (!%p881_p9)
}
 0x297   :  { %518 = dma.vmem_to_hbm [thread:$0]  %s516_s29, 32, %s1153_s9, [#allocation4]  }
 0x298   :  { %895 = dma.done.wait [#allocation4], 32  }
 0x299   :  { %896 = vsyncadd [#allocation4], 4294967264 }
 0x29a   :  { %522 = vsyncpa [#allocation3], 1 }
 0x29b   :  { %523 = vsyncpa [#allocation6], 1 }
 0x29c   :  { %524 = vsyncpa [#allocation9], 1 }
 0x29d   :  { %525 = vsyncpa [#allocation12], 1 }
 0x29e   :  { %526 = vsyncpa [#allocation15], 1 }
 0x29f   :  { %527 = vsyncpa [#allocation4], 1 }

// kernel: graph_encoder.8
= control target key start
LH: loop header
LB: loop body
LE: loop exit
PB: predicated region body
PF: predicated region fallthrough
CT: control target
= control target key end

     0   :  { %13 = vsyncpa [#allocation3], 0  ;;  %s1271_s0 = inlined_call_operand.hbm [shape: f32[16,32], index: 0, kind: input, shape index: {}, may-alias: {0,1}]   ;;  %s1272_s1 = inlined_call_operand.hbm [shape: f32[16,32], index: 1, kind: input, shape index: {}, may-alias: {0,1}]   ;;  %s1273_s2 = inlined_call_operand.hbm [shape: bf16[32,32], index: 2, kind: input, shape index: {}]   ;;  %s1274_s3 = inlined_call_operand.hbm [shape: f32[1,32], index: 3, kind: input, shape index: {}]   ;;  %s1275_s4 = inlined_call_operand.hbm [shape: bf16[4,16,16], index: 4, kind: input, shape index: {}]   ;;  %s1276_s5 = inlined_call_operand.hbm [shape: f32[1,32], index: 5, kind: input, shape index: {}]   ;;  %s1277_s6 = inlined_call_operand.hbm [shape: bf16[32,32], index: 6, kind: input, shape index: {}]   ;;  %s1278_s7 = inlined_call_operand.hbm [shape: f32[1,32], index: 7, kind: input, shape index: {}]   ;;  %s1279_s8 = inlined_call_operand.hbm [shape: f32[16,32], index: 8, kind: output, shape index: {}]  }
   0x1   :  { %14 = vsyncpa [#allocation6], 0 }
   0x2   :  { %15 = vsyncpa [#allocation9], 0 }
   0x3   :  { %16 = vsyncpa [#allocation12], 0 }
   0x4   :  { %17 = vsyncpa [#allocation15], 0 }
   0x5   :  { %18 = vsyncpa [#allocation4], 0  ;;  %s1005_s27 = smov [#allocation5]   ;;  %s1006_s29 = smov [#allocation8]  }
   0x6   :  { %s36_s28 = sshll.u32 %s1005_s27, 4  ;;  %s61_s30 = sshll.u32 %s1006_s29, 4  ;;  %s37_s28 = int_to_ptr.vmem [resolvable:$true] %s36_s28  ;;  %s1070_s30 = int_to_ptr.vmem [resolvable:$true] %s61_s30 }
   0x7   :  { %s795_s11 = scalar_lea.hbm %s1272_s1, 256 }
   0x8   :  { %p796_p0 = scmp.ne.s32.totalorder %s1272_s1, %s795_s11  ;;  %p799_p1 = scmp.lt.u32.totalorder %s795_s11, %s1272_s1 }
   0xa   :  { %p801_p2 = pnand %p799_p1, %p796_p0 }
   0xc   :  { %804 = shalt.err (!%p801_p2)
}
   0xd   :  { %s805_s16 = scalar_lea.vmem %s37_s28, 256  ;;  %p810_p4 = scmp.lt.s32.totalorder %s37_s28, %s37_s28 }
   0xe   :  { %p806_p3 = scmp.ne.s32.totalorder %s37_s28, %s805_s16  ;;  %p811_p5 = scmp.lt.s32.totalorder %s805_s16, %s805_s16 }
  0x10   :  { %p812_p6 = por %p811_p5, %p810_p4 }
  0x12   :  { %p813_p7 = pnand %p812_p6, %p806_p3 }
  0x14   :  { %816 = shalt.err (!%p813_p7)
}
  0x15   :  { %s1007_s17 = smov 128   ;;  %s1008_s18 = smov 8  }
  0x16   :  { %42 = dma.hbm_to_vmem [thread:$0]  %s1272_s1, 256, %s37_s28, [#allocation6], %s1007_s17, %s1007_s17, %s1008_s18  }
  0x17   :  { %s817_s23 = scalar_lea.hbm %s1274_s3, 16 }
  0x18   :  { %p818_p8 = scmp.ne.s32.totalorder %s1274_s3, %s817_s23  ;;  %p821_p9 = scmp.lt.u32.totalorder %s817_s23, %s1274_s3 }
  0x1a   :  { %p823_p10 = pnand %p821_p9, %p818_p8 }
  0x1c   :  { %826 = shalt.err (!%p823_p10)
}
  0x1d   :  { %s827_s29 = scalar_lea.vmem %s1070_s30, 16  ;;  %s831_s1 = scalar_lea.vmem %s1070_s30, 32 }
  0x1e   :  { %p828_p11 = scmp.ne.s32.totalorder %s1070_s30, %s827_s29  ;;  %p832_p12 = scmp.lt.s32.totalorder %s1070_s30, %s1070_s30 }
  0x1f   :  { %p833_p13 = scmp.lt.s32.totalorder %s831_s1, %s827_s29 }
  0x21   :  { %p834_p0 = por %p833_p13, %p832_p12 }
  0x23   :  { %p835_p1 = pnand %p834_p0, %p828_p11 }
  0x25   :  { %838 = shalt.err (!%p835_p1)
}
  0x26   :  { %64 = dma.hbm_to_vmem [thread:$0]  %s1274_s3, 16, %s1070_s30, [#allocation9]  }
  0x27   :  { %s1009_s10 = smov [#allocation11]   ;;  %s1010_s12 = smov [#allocation2]  }
  0x28   :  { %s83_s11 = sshll.u32 %s1009_s10, 4  ;;  %s24_s13 = sshll.u32 %s1010_s12, 4  ;;  %s84_s11 = int_to_ptr.vmem [resolvable:$true] %s83_s11  ;;  %s1105_s13 = int_to_ptr.vmem [resolvable:$true] %s24_s13 }
  0x29   :  { %s839_s16 = scalar_lea.hbm %s1276_s5, 16 }
  0x2a   :  { %p840_p2 = scmp.ne.s32.totalorder %s1276_s5, %s839_s16  ;;  %p843_p3 = scmp.lt.u32.totalorder %s839_s16, %s1276_s5 }
  0x2c   :  { %p845_p4 = pnand %p843_p3, %p840_p2 }
  0x2e   :  { %848 = shalt.err (!%p845_p4)
}
  0x2f   :  { %s849_s3 = scalar_lea.vmem %s84_s11, 16  ;;  %s853_s30 = scalar_lea.vmem %s84_s11, 32 }
  0x30   :  { %p850_p5 = scmp.ne.s32.totalorder %s84_s11, %s849_s3  ;;  %p854_p6 = scmp.lt.s32.totalorder %s84_s11, %s84_s11 }
  0x31   :  { %p855_p7 = scmp.lt.s32.totalorder %s853_s30, %s849_s3 }
  0x33   :  { %p856_p8 = por %p855_p7, %p854_p6 }
  0x35   :  { %p857_p9 = pnand %p856_p8, %p850_p5 }
  0x37   :  { %860 = shalt.err (!%p857_p9)
}
  0x38   :  { %86 = dma.hbm_to_vmem [thread:$0]  %s1276_s5, 16, %s84_s11, [#allocation12]  }
  0x39   :  { %s861_s27 = scalar_lea.hbm %s1271_s0, 256 }
  0x3a   :  { %p862_p10 = scmp.ne.s32.totalorder %s1271_s0, %s861_s27  ;;  %p865_p11 = scmp.lt.u32.totalorder %s861_s27, %s1271_s0 }
  0x3c   :  { %p867_p12 = pnand %p865_p11, %p862_p10 }
  0x3e   :  { %870 = shalt.err (!%p867_p12)
}
  0x3f   :  { %s871_s10 = scalar_lea.vmem %s1105_s13, 256  ;;  %p876_p0 = scmp.lt.s32.totalorder %s1105_s13, %s1105_s13 }
  0x40   :  { %p872_p13 = scmp.ne.s32.totalorder %s1105_s13, %s871_s10  ;;  %p877_p1 = scmp.lt.s32.totalorder %s871_s10, %s871_s10 }
  0x42   :  { %p878_p2 = por %p877_p1, %p876_p0 }
  0x44   :  { %p879_p3 = pnand %p878_p2, %p872_p13 }
  0x46   :  { %882 = shalt.err (!%p879_p3)
}
  0x47   :  { %30 = dma.hbm_to_vmem [thread:$0]  %s1271_s0, 256, %s1105_s13, [#allocation3], %s1007_s17, %s1007_s17, %s1008_s18  }
  0x48   :  { %s1011_s12 = smov [#allocation7]   ;;  %s883_s19 = scalar_lea.hbm %s1273_s2, 256 }
  0x49   :  { %s48_s14 = sshll.u32 %s1011_s12, 4  ;;  %p884_p4 = scmp.ne.s32.totalorder %s1273_s2, %s883_s19  ;;  %s49_s14 = int_to_ptr.vmem [resolvable:$true] %s48_s14 }
  0x4a   :  { %p887_p5 = scmp.lt.u32.totalorder %s883_s19, %s1273_s2 }
  0x4c   :  { %p889_p6 = pnand %p887_p5, %p884_p4 }
  0x4e   :  { %892 = shalt.err (!%p889_p6)
}
  0x4f   :  { %s893_s30 = scalar_lea.vmem %s49_s14, 256  ;;  %p898_p8 = scmp.lt.s32.totalorder %s49_s14, %s49_s14 }
  0x50   :  { %p894_p7 = scmp.ne.s32.totalorder %s49_s14, %s893_s30  ;;  %p899_p9 = scmp.lt.s32.totalorder %s893_s30, %s893_s30 }
  0x52   :  { %p900_p10 = por %p899_p9, %p898_p8 }
  0x54   :  { %p901_p11 = pnand %p900_p10, %p894_p7 }
  0x56   :  { %904 = shalt.err (!%p901_p11)
}
  0x57   :  { %s1012_s0 = smov 64   ;;  %s1013_s13 = smov 4  }
  0x58   :  { %54 = dma.hbm_to_vmem [thread:$0]  %s1273_s2, 256, %s49_s14, [#allocation6], %s1012_s0, %s1012_s0, %s1013_s13  }
  0x59   :  { %s1014_s25 = smov [#allocation10]   ;;  %s1015_s27 = smov [#allocation13]  }
  0x5a   :  { %s70_s26 = sshll.u32 %s1014_s25, 4  ;;  %s92_s29 = sshll.u32 %s1015_s27, 4  ;;  %s71_s26 = int_to_ptr.vmem [resolvable:$true] %s70_s26  ;;  %s93_s29 = int_to_ptr.vmem [resolvable:$true] %s92_s29 }
  0x5b   :  { %s905_s9 = scalar_lea.hbm %s1275_s4, 512 }
  0x5c   :  { %p906_p12 = scmp.ne.s32.totalorder %s1275_s4, %s905_s9  ;;  %p909_p13 = scmp.lt.u32.totalorder %s905_s9, %s1275_s4 }
  0x5e   :  { %p911_p0 = pnand %p909_p13, %p906_p12 }
  0x60   :  { %914 = shalt.err (!%p911_p0)
}
  0x61   :  { %s915_s2 = scalar_lea.vmem %s71_s26, 512  ;;  %p920_p2 = scmp.lt.s32.totalorder %s71_s26, %s71_s26 }
  0x62   :  { %p916_p1 = scmp.ne.s32.totalorder %s71_s26, %s915_s2  ;;  %p921_p3 = scmp.lt.s32.totalorder %s915_s2, %s915_s2 }
  0x64   :  { %p922_p4 = por %p921_p3, %p920_p2 }
  0x66   :  { %p923_p5 = pnand %p922_p4, %p916_p1 }
  0x68   :  { %926 = shalt.err (!%p923_p5)
}
  0x69   :  { %76 = dma.hbm_to_vmem [thread:$0]  %s1275_s4, 512, %s71_s26, [#allocation9], %s1012_s0, %s1012_s0, %s1013_s13  }
  0x6a   :  { %s927_s20 = scalar_lea.hbm %s1277_s6, 256 }
  0x6b   :  { %p928_p6 = scmp.ne.s32.totalorder %s1277_s6, %s927_s20  ;;  %p931_p7 = scmp.lt.u32.totalorder %s927_s20, %s1277_s6 }
  0x6d   :  { %p933_p8 = pnand %p931_p7, %p928_p6 }
  0x6f   :  { %936 = shalt.err (!%p933_p8)
}
  0x70   :  { %s937_s23 = scalar_lea.vmem %s93_s29, 256  ;;  %p942_p10 = scmp.lt.s32.totalorder %s93_s29, %s93_s29 }
  0x71   :  { %p938_p9 = scmp.ne.s32.totalorder %s93_s29, %s937_s23  ;;  %p943_p11 = scmp.lt.s32.totalorder %s937_s23, %s937_s23 }
  0x73   :  { %p944_p12 = por %p943_p11, %p942_p10 }
  0x75   :  { %p945_p13 = pnand %p944_p12, %p938_p9 }
  0x77   :  { %948 = shalt.err (!%p945_p13)
}
  0x78   :  { %98 = dma.hbm_to_vmem [thread:$0]  %s1277_s6, 256, %s93_s29, [#allocation12], %s1012_s0, %s1012_s0, %s1013_s13  }
  0x79   :  { %s1016_s25 = smov [#allocation14]   ;;  %s949_s28 = scalar_lea.hbm %s1278_s7, 16 }
  0x7a   :  { %s105_s26 = sshll.u32 %s1016_s25, 4  ;;  %p950_p0 = scmp.ne.s32.totalorder %s1278_s7, %s949_s28  ;;  %s106_s26 = int_to_ptr.vmem [resolvable:$true] %s105_s26 }
  0x7b   :  { %p953_p1 = scmp.lt.u32.totalorder %s949_s28, %s1278_s7 }
  0x7d   :  { %p955_p2 = pnand %p953_p1, %p950_p0 }
  0x7f   :  { %958 = shalt.err (!%p955_p2)
}
  0x80   :  { %s959_s12 = scalar_lea.vmem %s106_s26, 16  ;;  %s963_s6 = scalar_lea.vmem %s106_s26, 32 }
  0x81   :  { %p960_p3 = scmp.ne.s32.totalorder %s106_s26, %s959_s12  ;;  %p964_p4 = scmp.lt.s32.totalorder %s106_s26, %s106_s26 }
  0x82   :  { %p965_p5 = scmp.lt.s32.totalorder %s963_s6, %s959_s12 }
  0x84   :  { %p966_p6 = por %p965_p5, %p964_p4 }
  0x86   :  { %p967_p7 = pnand %p966_p6, %p960_p3 }
  0x88   :  { %970 = shalt.err (!%p967_p7)
}
  0x89   :  { %108 = dma.hbm_to_vmem [thread:$0]  %s1278_s7, 16, %s106_s26, [#allocation15]  }
  0x8a   :  { %993 = dma.done.wait [#allocation3], 256  }
  0x8b   :  { %994 = vsyncadd [#allocation3], 4294967040 }
  0x8c   :  { %995 = dma.done.wait [#allocation6], 512  }
  0x8d   :  { %996 = vsyncadd [#allocation6], 4294966784 }
  0x8e   :  { %997 = dma.done.wait [#allocation9], 528  }
  0x8f   :  { %998 = vsyncadd [#allocation9], 4294966768 }
  0x90   :  { %999 = dma.done.wait [#allocation12], 272  }
  0x91   :  { %1000 = vsyncadd [#allocation12], 4294967024 }
  0x92   :  { %1001 = dma.done.wait [#allocation15], 16  }
  0x93   :  { %1002 = vsyncadd [#allocation15], 4294967280  ;;  %v1017_v0 = vmov 0.0   ;;  %vm1018_vm0 = vmmov 0   ;;  %v755_v1 = vld [vmem:[#allocation7] sm:$0xff]   ;;  %v666_v2 = vld [vmem:[#allocation10] sm:$0xff]  }
  0x94   :  { %695 = vmatprep.subr.bf16.mxu0 %v1017_v0  ;;  %699 = vmatprep.mubr.msk.bf16.mxu0 %vm1018_vm0, %v1017_v0  ;;  %vm210_vm1 = vcmask 130048   ;;  %v667_v3 = vunpack.c.l.bf16 %v666_v2  ;;  %v756_v4 = vld [vmem:[#allocation7 + $0x8] sm:$0xff]   ;;  %v670_v5 = vld [vmem:[#allocation10 + $0x8] sm:$0xff]   ;;  %v668_v6 = vunpack.c.h.bf16 %v666_v2  ;;  %v134_v7 = vld [vmem:[#allocation5] sm:$0xff]  ;;  %vm160_vm2 = vcmask 261120   ;;  %s1019_s7 = smov 112  }
  0x95   :  { %703 = vmatprep.subr.bf16.mxu1 %v1017_v0  ;;  %705 = vmatprep.mubr.msk.bf16.mxu1 %vm1018_vm0, %v1017_v0  ;;  %v671_v8 = vunpack.c.l.bf16 %v670_v5  ;;  %v135_v9 = vld [vmem:[#allocation5 + $0x8] sm:$0xff]  ;;  %v672_v10 = vunpack.c.h.bf16 %v670_v5  ;;  %v674_v11 = vld [vmem:[#allocation10 + $0x10] sm:$0xff]   ;;  %v678_v19 = vld [vmem:[#allocation10 + $0x18] sm:$0xff]   ;;  %s1020_s29 = smov 120   ;;  %s1021_s2 = smov 104   ;;  %vm528_vm3 = vcmask 64512  }
  0x96   :  { %696 = vmatpush3.bf16.msra.mxu0 %v755_v1  ;;  %v211_v12 = vsel %vm210_vm1, %v667_v3, -inf  ;;  %v140_v14 = vpack.c.bf16 %v135_v9, %v134_v7  ;;  %v214_v15 = vsel %vm210_vm1, %v668_v6, -inf  ;;  %v675_v16 = vunpack.c.l.bf16 %v674_v11  ;;  %s1022_s14 = smov 16   ;;  %s1023_s15 = smov 24  }
  0x97   :  { %697 = vmatprep.subr.bf16.mxu0 %v1017_v0  ;;  %212 = vmax.xlane.f32.xlu0 %v211_v12  ;;  %v283_v13 = vsel %vm210_vm1, %v671_v8, -inf  ;;  %v286_v17 = vsel %vm210_vm1, %v672_v10, -inf  ;;  %v676_v18 = vunpack.c.h.bf16 %v674_v11  ;;  %v679_v21 = vunpack.c.l.bf16 %v678_v19  ;;  %s1024_s16 = smov [#allocation16]  }
  0x98   :  { %284 = vmax.xlane.f32.xlu1 %v283_v13  ;;  %v359_v20 = vsel %vm210_vm1, %v675_v16, -inf  ;;  %v680_v23 = vunpack.c.h.bf16 %v678_v19  ;;  %vm533_vm4 = vcmask 195584   ;;  %s636_s19 = sshll.u32 %s1024_s16, 4  ;;  %s637_s19 = int_to_ptr.vmem [resolvable:$true] %s636_s19 }
  0x99   :  { %v362_v22 = vsel %vm210_vm1, %v676_v18, -inf  ;;  %v434_v24 = vsel %vm210_vm1, %v679_v21, -inf  ;;  %s971_s20 = scalar_lea.vmem %s637_s19, 256  ;;  %p976_p9 = scmp.lt.s32.totalorder %s637_s19, %s637_s19 }
  0x9a   :  { %698 = vmatpush3.bf16.msra.mxu0 %v756_v4  ;;  %v437_v25 = vsel %vm210_vm1, %v680_v23, -inf  ;;  %p972_p8 = scmp.ne.s32.totalorder %s637_s19, %s971_s20  ;;  %p977_p10 = scmp.lt.s32.totalorder %s971_s20, %s971_s20 }
  0x9b   :  { %715 = vmatprep.subr.bf16.mxu0 %v1017_v0  ;;  %215 = vmax.xlane.f32.xlu0 %v214_v15 }
  0x9c   :  { %287 = vmax.xlane.f32.xlu1 %v286_v17  ;;  %p978_p11 = por %p977_p10, %p976_p9 }
  0x9d   :  { %700 = vmatmul.mubr.msk.bf16.vlgmr.msra.gmra.mrb[0].mxu0 %vm160_vm2, %v140_v14 }
  0x9e   :  { %717 = vmatprep.mubr.msk.bf16.mxu0 %vm1018_vm0, %v1017_v0  ;;  %p979_p12 = pnand %p978_p11, %p972_p8 }
  0x9f   :  { %360 = vmax.xlane.f32.xlu0 %v359_v20 }
  0xa0   :  { %363 = vmax.xlane.f32.xlu1 %v362_v22 }
  0xa3   :  { %435 = vmax.xlane.f32.xlu0 %v434_v24 }
  0xa4   :  { %438 = vmax.xlane.f32.xlu1 %v437_v25 }
 0x124   :  { %v213_v26 = vpop.xlane.xlu0 %212 }
 0x125   :  { %v217_v27 = vsub.f32 %v667_v3, %v213_v26  ;;  %v285_v28 = vpop.xlane.xlu1 %284  ;;  %v652_v3 = vld [vmem:[#allocation8] ss:$0 sm:$0xff] }
 0x126   :  { %v289_v29 = vsub.f32 %v671_v8, %v285_v28 }
 0x127   :  { %v219_v30 = vmul.f32 1.442695, %v217_v27 }
 0x128   :  { %v291_v31 = vmul.f32 1.442695, %v289_v29  ;;  %v216_v32 = vpop.xlane.xlu0 %215 }
 0x129   :  { %759 = vpow2.f32 %v219_v30  ;;  %v218_v33 = vsub.f32 %v668_v6, %v216_v32  ;;  %v288_v34 = vpop.xlane.xlu1 %287 }
 0x12a   :  { %761 = vpow2.f32 %v291_v31  ;;  %v290_v35 = vsub.f32 %v672_v10, %v288_v34 }
 0x12b   :  { %v221_v36 = vmul.f32 1.442695, %v218_v33 }
 0x12c   :  { %v293_v37 = vmul.f32 1.442695, %v290_v35  ;;  %v361_v38 = vpop.xlane.xlu0 %360 }
 0x12d   :  { %763 = vpow2.f32 %v221_v36  ;;  %v365_v39 = vsub.f32 %v675_v16, %v361_v38  ;;  %v364_v40 = vpop.xlane.xlu1 %363 }
 0x12e   :  { %765 = vpow2.f32 %v293_v37  ;;  %v366_v41 = vsub.f32 %v676_v18, %v364_v40 }
 0x12f   :  { %v367_v42 = vmul.f32 1.442695, %v365_v39 }
 0x130   :  { %v369_v43 = vmul.f32 1.442695, %v366_v41  ;;  %v436_v44 = vpop.xlane.xlu0 %435 }
 0x131   :  { %767 = vpow2.f32 %v367_v42  ;;  %v440_v45 = vsub.f32 %v679_v21, %v436_v44  ;;  %v439_v46 = vpop.xlane.xlu1 %438 }
 0x132   :  { %769 = vpow2.f32 %v369_v43  ;;  %v441_v47 = vsub.f32 %v680_v23, %v439_v46  ;;  %v757_v46 = vld [vmem:[#allocation13] sm:$0xff]  }
 0x133   :  { %v760_v48 = vpop.eup %759  ;;  %v442_v49 = vmul.f32 1.442695, %v440_v45 }
 0x134   :  { %v1215_v50 = vpop.eup %761  ;;  %v444_v51 = vmul.f32 1.442695, %v441_v47  ;;  %v223_v52 = vsel %vm210_vm1, %v760_v48, 0.0 }
 0x135   :  { %771 = vpow2.f32 %v442_v49  ;;  %224 = vadd.xlane.f32.xlu0 %v223_v52  ;;  %v295_v53 = vsel %vm210_vm1, %v1215_v50, 0.0 }
 0x136   :  { %773 = vpow2.f32 %v444_v51 }
 0x137   :  { %v764_v54 = vpop.eup %763 }
 0x138   :  { %v766_v55 = vpop.eup %765  ;;  %v226_v56 = vsel %vm210_vm1, %v764_v54, 0.0 }
 0x139   :  { %296 = vadd.xlane.f32.xlu0 %v295_v53  ;;  %227 = vadd.xlane.f32.xlu1 %v226_v56  ;;  %v298_v57 = vsel %vm210_vm1, %v766_v55, 0.0  ;;  %v758_v53 = vld [vmem:[#allocation13 + $0x8] sm:$0xff]  }
 0x13b   :  { %v768_v58 = vpop.eup %767 }
 0x13c   :  { %v770_v59 = vpop.eup %769  ;;  %v371_v60 = vsel %vm210_vm1, %v768_v58, 0.0 }
 0x13d   :  { %299 = vadd.xlane.f32.xlu1 %v298_v57  ;;  %372 = vadd.xlane.f32.xlu0 %v371_v60  ;;  %v374_v61 = vsel %vm210_vm1, %v770_v59, 0.0 }
 0x13f   :  { %v1224_v62 = vpop.eup %771 }
 0x140   :  { %v1226_v63 = vpop.eup %773  ;;  %v446_v1 = vsel %vm210_vm1, %v1224_v62, 0.0 }
 0x141   :  { %375 = vadd.xlane.f32.xlu1 %v374_v61  ;;  %447 = vadd.xlane.f32.xlu0 %v446_v1  ;;  %v449_v2 = vsel %vm210_vm1, %v1226_v63, 0.0  ;;  %v536_v1 = vld [vmem:[#allocation2] sm:$0xff] }
 0x145   :  { %450 = vadd.xlane.f32.xlu1 %v449_v2 }
 0x170   :  { %v198_v4 = vpop.f32.mrb[0].mxu0 }
 0x171   :  { %v701_v5 = vpop.f32.mrb[1].mxu0  ;;  %v199_v7 = vadd.f32 %v652_v3, %v198_v4 }
 0x172   :  { %v201_v6 = vpop.f32.mrb[2].mxu0 }
 0x173   :  { %v202_v8 = vadd.f32 %v652_v3, %v201_v6  ;;  %v702_v9 = vpop.f32.mrb[3].mxu0  ;;  %v537_v6 = vld [vmem:[#allocation2 + $0x8] sm:$0xff] }
 0x175   :  { %v205_v10 = vpack.c.bf16 %v202_v8, %v199_v7 }
 0x177   :  { %382 = vrot.lane.b32.xlu1 %v205_v10, %s1019_s7  ;;  %307 = vrot.lane.b32.xlu0 %v205_v10, %s1020_s29 }
 0x178   :  { %704 = vmatpush3.bf16.msra.mxu1 %v205_v10 }
 0x179   :  { %709 = vmatprep.subr.bf16.mxu1 %v1017_v0 }
 0x17b   :  { %457 = vrot.lane.b32.xlu1 %v205_v10, %s1021_s2  ;;  %v660_v10 = vld [vmem:[#allocation11] ss:$0 sm:$0xff] }
 0x1c2   :  { %v225_v11 = vpop.xlane.xlu0 %224 }
 0x1c3   :  { %775 = vrcp.f32 %v225_v11 }
 0x1c6   :  { %v228_v12 = vpop.xlane.xlu1 %227  ;;  %v297_v16 = vpop.xlane.xlu0 %296 }
 0x1c7   :  { %777 = vrcp.f32 %v228_v12 }
 0x1ca   :  { %v300_v14 = vpop.xlane.xlu1 %299  ;;  %v373_v21 = vpop.xlane.xlu0 %372 }
 0x1cb   :  { %779 = vrcp.f32 %v300_v14 }
 0x1cd   :  { %v776_v13 = vpop.eup %775 }
 0x1ce   :  { %v231_v17 = vmul.f32 %v776_v13, %v760_v48  ;;  %v376_v20 = vpop.xlane.xlu1 %375  ;;  %v448_v23 = vpop.xlane.xlu0 %447 }
 0x1cf   :  { %781 = vrcp.f32 %v376_v20 }
 0x1d0   :  { %783 = vrcp.f32 %v297_v16  ;;  %v661_v16 = vld [vmem:[#allocation14] ss:$0 sm:$0xff] }
 0x1d1   :  { %v778_v15 = vpop.eup %777  ;;  %785 = vrcp.f32 %v373_v21 }
 0x1d2   :  { %v232_v18 = vmul.f32 %v778_v15, %v764_v54  ;;  %v451_v22 = vpop.xlane.xlu1 %450 }
 0x1d3   :  { %787 = vrcp.f32 %v451_v22 }
 0x1d4   :  { %v233_v19 = vpack.c.bf16 %v232_v18, %v231_v17  ;;  %789 = vrcp.f32 %v448_v23 }
 0x1d5   :  { %v780_v24 = vpop.eup %779 }
 0x1d6   :  { %706 = vmatmul.mubr.msk.bf16.vlgmr.msra.gmra.mrb[0].mxu1 %vm210_vm1, %v233_v19  ;;  %v304_v28 = vmul.f32 %v780_v24, %v766_v55 }
 0x1d7   :  { %711 = vmatprep.mubr.msk.bf16.mxu1 %vm1018_vm0, %v1017_v0 }
 0x1d9   :  { %v782_v25 = vpop.eup %781 }
 0x1da   :  { %v784_v26 = vpop.eup %783  ;;  %v380_v29 = vmul.f32 %v782_v25, %v770_v59 }
 0x1db   :  { %v786_v27 = vpop.eup %785  ;;  %v303_v30 = vmul.f32 %v784_v26, %v1215_v50 }
 0x1dc   :  { %v379_v31 = vmul.f32 %v786_v27, %v768_v58 }
 0x1dd   :  { %v305_v35 = vpack.c.bf16 %v304_v28, %v303_v30  ;;  %v788_v36 = vpop.eup %787 }
 0x1de   :  { %v381_v34 = vpack.c.bf16 %v380_v29, %v379_v31  ;;  %v790_v38 = vpop.eup %789  ;;  %v455_v39 = vmul.f32 %v788_v36, %v1226_v63 }
 0x1df   :  { %v454_v40 = vmul.f32 %v790_v38, %v1224_v62 }
 0x1e1   :  { %v456_v41 = vpack.c.bf16 %v455_v39, %v454_v40 }
 0x1e9   :  { %v383_v32 = vpop.permute.xlu1 %382  ;;  %v308_v33 = vpop.permute.xlu0 %307 }
 0x1ea   :  { %710 = vmatpush3.bf16.msra.mxu1 %v308_v33  ;;  %716 = vmatpush3.bf16.msra.mxu0 %v383_v32 }
 0x1eb   :  { %721 = vmatprep.subr.bf16.mxu1 %v1017_v0  ;;  %727 = vmatprep.subr.bf16.mxu0 %v1017_v0 }
 0x1ed   :  { %718 = vmatmul.mubr.msk.bf16.vlgmr.msra.gmra.mrb[4].mxu0 %vm210_vm1, %v381_v34  ;;  %v458_v37 = vpop.permute.xlu1 %457  ;;  %712 = vmatmul.mubr.msk.bf16.vlgmr.msra.gmra.mrb[4].mxu1 %vm210_vm1, %v305_v35 }
 0x1ee   :  { %722 = vmatpush3.bf16.msra.mxu1 %v458_v37  ;;  %723 = vmatprep.mubr.msk.bf16.mxu1 %vm1018_vm0, %v1017_v0 }
 0x1ef   :  { %731 = vmatprep.mubr.msk.bf16.mxu0 %vm1018_vm0, %v1017_v0  ;;  %728 = vmatpush3.bf16.msra.mxu0 %v757_v46 }
 0x1f0   :  { %729 = vmatprep.subr.bf16.mxu0 %v1017_v0 }
 0x1f3   :  { %730 = vmatpush3.bf16.msra.mxu0 %v758_v53 }
 0x1f5   :  { %724 = vmatmul.mubr.msk.bf16.vlgmr.msra.gmra.mrb[8].mxu1 %vm210_vm1, %v456_v41 }
 0x2a9   :  { %v271_v42 = vpop.f32.mrb[0].mxu1 }
 0x2aa   :  { %v707_v43 = vpop.f32.mrb[1].mxu1 }
 0x2ab   :  { %v274_v44 = vpop.f32.mrb[2].mxu1 }
 0x2ac   :  { %v708_v45 = vpop.f32.mrb[3].mxu1 }
 0x2c0   :  { %v347_v47 = vpop.f32.mrb[4].mxu1  ;;  %v422_v48 = vpop.f32.mrb[4].mxu0 }
 0x2c1   :  { %506 = vrot.lane.b32.xlu1 %v347_v47, %s1008_s18  ;;  %v713_v49 = vpop.f32.mrb[5].mxu1  ;;  %v719_v50 = vpop.f32.mrb[5].mxu0 }
 0x2c2   :  { %v350_v51 = vpop.f32.mrb[6].mxu1  ;;  %v425_v52 = vpop.f32.mrb[6].mxu0 }
 0x2c3   :  { %508 = vrot.lane.b32.xlu0 %v350_v51, %s1008_s18  ;;  %v714_v54 = vpop.f32.mrb[7].mxu1  ;;  %v720_v55 = vpop.f32.mrb[7].mxu0 }
 0x2c5   :  { %514 = vrot.lane.b32.xlu1 %v422_v48, %s1022_s14 }
 0x2c7   :  { %516 = vrot.lane.b32.xlu0 %v425_v52, %s1022_s14 }
 0x2c8   :  { %v497_v56 = vpop.f32.mrb[8].mxu1 }
 0x2c9   :  { %v725_v57 = vpop.f32.mrb[9].mxu1  ;;  %522 = vrot.lane.b32.xlu1 %v497_v56, %s1023_s15 }
 0x2ca   :  { %v500_v58 = vpop.f32.mrb[10].mxu1 }
 0x2cb   :  { %v726_v59 = vpop.f32.mrb[11].mxu1  ;;  %524 = vrot.lane.b32.xlu0 %v500_v58, %s1023_s15 }
 0x333   :  { %v507_v60 = vpop.permute.xlu1 %506 }
 0x334   :  { %v529_v63 = vsel %vm528_vm3, %v271_v42, %v507_v60 }
 0x335   :  { %v509_v0 = vpop.permute.xlu0 %508 }
 0x336   :  { %v530_v4 = vsel %vm528_vm3, %v274_v44, %v509_v0 }
 0x337   :  { %v515_v61 = vpop.permute.xlu1 %514 }
 0x338   :  { %v531_v2 = vsel %vm210_vm1, %v529_v63, %v515_v61 }
 0x339   :  { %v517_v62 = vpop.permute.xlu0 %516 }
 0x33a   :  { %v532_v7 = vsel %vm210_vm1, %v530_v4, %v517_v62 }
 0x33b   :  { %v523_v3 = vpop.permute.xlu1 %522 }
 0x33c   :  { %v534_v5 = vsel %vm533_vm4, %v531_v2, %v523_v3 }
 0x33d   :  { %v538_v8 = vadd.f32 %v536_v1, %v534_v5  ;;  %v525_v9 = vpop.permute.xlu0 %524 }
 0x33e   :  { %v535_v11 = vsel %vm533_vm4, %v532_v7, %v525_v9 }
 0x33f   :  { %v539_v12 = vadd.f32 %v537_v6, %v535_v11  ;;  %v547_v13 = vadd.f32 %v660_v10, %v538_v8 }
 0x341   :  { %v548_v14 = vadd.f32 %v660_v10, %v539_v12 }
 0x343   :  { %v553_v15 = vpack.c.bf16 %v548_v14, %v547_v13 }
 0x345   :  { %732 = vmatmul.mubr.msk.bf16.vlgmr.msra.gmra.mrb[8].mxu0 %vm160_vm2, %v553_v15 }
 0x418   :  { %v610_v17 = vpop.f32.mrb[8].mxu0 }
 0x419   :  { %v611_v18 = vadd.f32 %v661_v16, %v610_v17  ;;  %v733_v19 = vpop.f32.mrb[9].mxu0 }
 0x41a   :  { %v613_v20 = vpop.f32.mrb[10].mxu0 }
 0x41b   :  { %v619_v21 = vmul.f32 0.70710677, %v611_v18  ;;  %v614_v22 = vadd.f32 %v661_v16, %v613_v20  ;;  %v734_v23 = vpop.f32.mrb[11].mxu0  ;;  %v617_v26 = vmul.f32 0.5, %v611_v18 }
 0x41d   :  { %791 = verf.f32 %v619_v21  ;;  %v620_v24 = vmul.f32 0.70710677, %v614_v22  ;;  %v618_v30 = vmul.f32 0.5, %v614_v22 }
 0x41f   :  { %793 = verf.f32 %v620_v24 }
 0x427   :  { %v792_v25 = vpop.eup %791 }
 0x428   :  { %v623_v27 = vadd.f32 1.0, %v792_v25 }
 0x429   :  { %v794_v28 = vpop.eup %793 }
 0x42a   :  { %v625_v29 = vmul.f32 %v623_v27, %v617_v26  ;;  %v624_v31 = vadd.f32 1.0, %v794_v28 }
 0x42c   :  { %v627_v32 = vadd.f32 %v625_v29, %v547_v13  ;;  %v626_v33 = vmul.f32 %v624_v31, %v618_v30 }
 0x42e   :  { %629 = vst.msk [vmem:[#allocation16] sm:$0xff] %vm160_vm2, %v627_v32  ;;  %v628_v34 = vadd.f32 %v626_v33, %v548_v14 }
 0x430   :  { %630 = vst.msk [vmem:[#allocation16 + $0x8] sm:$0xff] %vm160_vm2, %v628_v34 }
 0x431   :  { %982 = shalt.err (!%p979_p12)
}
 0x432   :  { %s983_s3 = scalar_lea.hbm %s1279_s8, 256 }
 0x433   :  { %p984_p13 = scmp.ne.s32.totalorder %s1279_s8, %s983_s3  ;;  %p987_p0 = scmp.lt.u32.totalorder %s983_s3, %s1279_s8 }
 0x435   :  { %p989_p1 = pnand %p987_p0, %p984_p13 }
 0x437   :  { %992 = shalt.err (!%p989_p1)
}
 0x438   :  { %642 = dma.vmem_to_hbm [thread:$0]  %s637_s19, 256, %s1279_s8, [#allocation4], %s1007_s17, %s1007_s17, %s1008_s18  }
 0x439   :  { %1003 = dma.done.wait [#allocation4], 256  }
 0x43a   :  { %1004 = vsyncadd [#allocation4], 4294967040 }
 0x43b   :  { %646 = vsyncpa [#allocation3], 1 }
 0x43c   :  { %647 = vsyncpa [#allocation6], 1 }
 0x43d   :  { %648 = vsyncpa [#allocation9], 1 }
 0x43e   :  { %649 = vsyncpa [#allocation12], 1 }
 0x43f   :  { %650 = vsyncpa [#allocation15], 1 }
 0x440   :  { %651 = vsyncpa [#allocation4], 1 }

// kernel: graph_encoder.11
= control target key start
LH: loop header
LB: loop body
LE: loop exit
PB: predicated region body
PF: predicated region fallthrough
CT: control target
= control target key end

     0   :  { %10 = vsyncpa [#allocation3], 0  ;;  %s561_s0 = inlined_call_operand.hbm [shape: f32[16,32], index: 0, kind: input, shape index: {}]   ;;  %s562_s1 = inlined_call_operand.hbm [shape: bf16[32,32], index: 1, kind: input, shape index: {}]   ;;  %s563_s2 = inlined_call_operand.hbm [shape: f32[1,32], index: 2, kind: input, shape index: {}]   ;;  %s564_s3 = inlined_call_operand.hbm [shape: bf16[32,16], index: 3, kind: input, shape index: {}]   ;;  %s565_s4 = inlined_call_operand.hbm [shape: f32[1,16], index: 4, kind: input, shape index: {}]   ;;  %s566_s5 = inlined_call_operand.hbm [shape: f32[16,16], index: 5, kind: output, shape index: {}]  }
   0x1   :  { %11 = vsyncpa [#allocation6], 0 }
   0x2   :  { %12 = vsyncpa [#allocation9], 0 }
   0x3   :  { %13 = vsyncpa [#allocation4], 0  ;;  %s439_s18 = smov [#allocation5]   ;;  %s299_s22 = scalar_lea.hbm %s562_s1, 256 }
   0x4   :  { %s31_s19 = sshll.u32 %s439_s18, 4  ;;  %p300_p0 = scmp.ne.s32.totalorder %s562_s1, %s299_s22  ;;  %s32_s19 = int_to_ptr.vmem [resolvable:$true] %s31_s19 }
   0x5   :  { %p303_p1 = scmp.lt.u32.totalorder %s299_s22, %s562_s1 }
   0x7   :  { %p305_p2 = pnand %p303_p1, %p300_p0 }
   0x9   :  { %308 = shalt.err (!%p305_p2)
}
   0xa   :  { %s309_s27 = scalar_lea.vmem %s32_s19, 256  ;;  %p314_p4 = scmp.lt.s32.totalorder %s32_s19, %s32_s19 }
   0xb   :  { %p310_p3 = scmp.ne.s32.totalorder %s32_s19, %s309_s27  ;;  %p315_p5 = scmp.lt.s32.totalorder %s309_s27, %s309_s27 }
   0xd   :  { %p316_p6 = por %p315_p5, %p314_p4 }
   0xf   :  { %p317_p7 = pnand %p316_p6, %p310_p3 }
  0x11   :  { %320 = shalt.err (!%p317_p7)
}
  0x12   :  { %s440_s28 = smov 64   ;;  %s441_s29 = smov 4  }
  0x13   :  { %37 = dma.hbm_to_vmem [thread:$0]  %s562_s1, 256, %s32_s19, [#allocation6], %s440_s28, %s440_s28, %s441_s29  }
  0x14   :  { %s442_s7 = smov [#allocation8]   ;;  %s443_s9 = smov [#allocation2]  }
  0x15   :  { %s53_s8 = sshll.u32 %s442_s7, 4  ;;  %s19_s10 = sshll.u32 %s443_s9, 4  ;;  %s54_s8 = int_to_ptr.vmem [resolvable:$true] %s53_s8  ;;  %s20_s10 = int_to_ptr.vmem [resolvable:$true] %s19_s10 }
  0x16   :  { %s321_s13 = scalar_lea.hbm %s564_s3, 256 }
  0x17   :  { %p322_p8 = scmp.ne.s32.totalorder %s564_s3, %s321_s13  ;;  %p325_p9 = scmp.lt.u32.totalorder %s321_s13, %s564_s3 }
  0x19   :  { %p327_p10 = pnand %p325_p9, %p322_p8 }
  0x1b   :  { %330 = shalt.err (!%p327_p10)
}
  0x1c   :  { %s331_s1 = scalar_lea.vmem %s54_s8, 256  ;;  %p336_p12 = scmp.lt.s32.totalorder %s54_s8, %s54_s8 }
  0x1d   :  { %p332_p11 = scmp.ne.s32.totalorder %s54_s8, %s331_s1  ;;  %p337_p13 = scmp.lt.s32.totalorder %s331_s1, %s331_s1 }
  0x1f   :  { %p338_p0 = por %p337_p13, %p336_p12 }
  0x21   :  { %p339_p1 = pnand %p338_p0, %p332_p11 }
  0x23   :  { %342 = shalt.err (!%p339_p1)
}
  0x24   :  { %59 = dma.hbm_to_vmem [thread:$0]  %s564_s3, 256, %s54_s8, [#allocation9], %s440_s28, %s440_s28, %s441_s29  }
  0x25   :  { %s343_s22 = scalar_lea.hbm %s561_s0, 256 }
  0x26   :  { %p344_p2 = scmp.ne.s32.totalorder %s561_s0, %s343_s22  ;;  %p347_p3 = scmp.lt.u32.totalorder %s343_s22, %s561_s0 }
  0x28   :  { %p349_p4 = pnand %p347_p3, %p344_p2 }
  0x2a   :  { %352 = shalt.err (!%p349_p4)
}
  0x2b   :  { %s353_s27 = scalar_lea.vmem %s20_s10, 256  ;;  %p358_p6 = scmp.lt.s32.totalorder %s20_s10, %s20_s10 }
  0x2c   :  { %p354_p5 = scmp.ne.s32.totalorder %s20_s10, %s353_s27  ;;  %p359_p7 = scmp.lt.s32.totalorder %s353_s27, %s353_s27 }
  0x2e   :  { %p360_p8 = por %p359_p7, %p358_p6 }
  0x30   :  { %p361_p9 = pnand %p360_p8, %p354_p5 }
  0x32   :  { %364 = shalt.err (!%p361_p9)
}
  0x33   :  { %s444_s3 = smov 128   ;;  %s445_s28 = smov 8  }
  0x34   :  { %25 = dma.hbm_to_vmem [thread:$0]  %s561_s0, 256, %s20_s10, [#allocation3], %s444_s3, %s444_s3, %s445_s28  }
  0x35   :  { %s446_s6 = smov [#allocation7]   ;;  %s447_s8 = smov [#allocation10]  }
  0x36   :  { %s44_s7 = sshll.u32 %s446_s6, 4  ;;  %s66_s9 = sshll.u32 %s447_s8, 4  ;;  %s45_s7 = int_to_ptr.vmem [resolvable:$true] %s44_s7  ;;  %s67_s9 = int_to_ptr.vmem [resolvable:$true] %s66_s9 }
  0x37   :  { %s365_s13 = scalar_lea.hbm %s563_s2, 16 }
  0x38   :  { %p366_p10 = scmp.ne.s32.totalorder %s563_s2, %s365_s13  ;;  %p369_p11 = scmp.lt.u32.totalorder %s365_s13, %s563_s2 }
  0x3a   :  { %p371_p12 = pnand %p369_p11, %p366_p10 }
  0x3c   :  { %374 = shalt.err (!%p371_p12)
}
  0x3d   :  { %s375_s0 = scalar_lea.vmem %s45_s7, 16  ;;  %s379_s10 = scalar_lea.vmem %s45_s7, 32 }
  0x3e   :  { %p376_p13 = scmp.ne.s32.totalorder %s45_s7, %s375_s0  ;;  %p380_p0 = scmp.lt.s32.totalorder %s45_s7, %s45_s7 }
  0x3f   :  { %p381_p1 = scmp.lt.s32.totalorder %s379_s10, %s375_s0 }
  0x41   :  { %p382_p2 = por %p381_p1, %p380_p0 }
  0x43   :  { %p383_p3 = pnand %p382_p2, %p376_p13 }
  0x45   :  { %386 = shalt.err (!%p383_p3)
}
  0x46   :  { %47 = dma.hbm_to_vmem [thread:$0]  %s563_s2, 16, %s45_s7, [#allocation6]  }
  0x47   :  { %s387_s21 = scalar_lea.hbm %s565_s4, 16 }
  0x48   :  { %p388_p4 = scmp.ne.s32.totalorder %s565_s4, %s387_s21  ;;  %p391_p5 = scmp.lt.u32.totalorder %s387_s21, %s565_s4 }
  0x4a   :  { %p393_p6 = pnand %p391_p5, %p388_p4 }
  0x4c   :  { %396 = shalt.err (!%p393_p6)
}
  0x4d   :  { %s397_s26 = scalar_lea.vmem %s67_s9, 16  ;;  %s401_s27 = scalar_lea.vmem %s67_s9, 32 }
  0x4e   :  { %p398_p7 = scmp.ne.s32.totalorder %s67_s9, %s397_s26  ;;  %p402_p8 = scmp.lt.s32.totalorder %s67_s9, %s67_s9 }
  0x4f   :  { %p403_p9 = scmp.lt.s32.totalorder %s401_s27, %s397_s26 }
  0x51   :  { %p404_p10 = por %p403_p9, %p402_p8 }
  0x53   :  { %p405_p11 = pnand %p404_p10, %p398_p7 }
  0x55   :  { %408 = shalt.err (!%p405_p11)
}
  0x56   :  { %69 = dma.hbm_to_vmem [thread:$0]  %s565_s4, 16, %s67_s9, [#allocation9]  }
  0x57   :  { %431 = dma.done.wait [#allocation3], 256  }
  0x58   :  { %432 = vsyncadd [#allocation3], 4294967040 }
  0x59   :  { %433 = dma.done.wait [#allocation6], 272  }
  0x5a   :  { %434 = vsyncadd [#allocation6], 4294967024 }
  0x5b   :  { %435 = dma.done.wait [#allocation9], 272  }
  0x5c   :  { %436 = vsyncadd [#allocation9], 4294967024  ;;  %v448_v0 = vmov 0.0   ;;  %vm449_vm0 = vmmov 0   ;;  %v295_v1 = vld [vmem:[#allocation5] sm:$0xff]   ;;  %v296_v2 = vld [vmem:[#allocation5 + $0x8] sm:$0xff]  }
  0x5d   :  { %267 = vmatprep.subr.bf16.mxu0 %v448_v0  ;;  %271 = vmatprep.mubr.msk.bf16.mxu0 %vm449_vm0, %v448_v0  ;;  %v86_v3 = vld [vmem:[#allocation2] sm:$0xff]  ;;  %v87_v4 = vld [vmem:[#allocation2 + $0x8] sm:$0xff]  ;;  %vm112_vm1 = vcmask 261120   ;;  %v257_v20 = vld [vmem:[#allocation10] ss:$0 sm:$0xff]  ;;  %vm231_vm4 = vcmask 130048  }
  0x5e   :  { %275 = vmatprep.subr.bf16.mxu1 %v448_v0  ;;  %279 = vmatprep.mubr.msk.bf16.mxu1 %vm449_vm0, %v448_v0  ;;  %v92_v5 = vpack.c.bf16 %v87_v4, %v86_v3  ;;  %v297_v6 = vld [vmem:[#allocation8] sm:$0xff]   ;;  %v298_v7 = vld [vmem:[#allocation8 + $0x8] sm:$0xff]   ;;  %v253_v8 = vld [vmem:[#allocation7] ss:$0 sm:$0xff]  ;;  %s450_s4 = smov [#allocation11]  }
  0x5f   :  { %268 = vmatpush3.bf16.msra.mxu0 %v295_v1  ;;  %276 = vmatpush3.bf16.msra.mxu1 %v297_v6  ;;  %s239_s30 = sshll.u32 %s450_s4, 4  ;;  %s240_s30 = int_to_ptr.vmem [resolvable:$true] %s239_s30 }
  0x60   :  { %269 = vmatprep.subr.bf16.mxu0 %v448_v0  ;;  %277 = vmatprep.subr.bf16.mxu1 %v448_v0  ;;  %s409_s6 = scalar_lea.vmem %s240_s30, 256  ;;  %p414_p13 = scmp.lt.s32.totalorder %s240_s30, %s240_s30 }
  0x61   :  { %p410_p12 = scmp.ne.s32.totalorder %s240_s30, %s409_s6  ;;  %p415_p0 = scmp.lt.s32.totalorder %s409_s6, %s409_s6 }
  0x63   :  { %270 = vmatpush3.bf16.msra.mxu0 %v296_v2  ;;  %278 = vmatpush3.bf16.msra.mxu1 %v298_v7  ;;  %p416_p1 = por %p415_p0, %p414_p13 }
  0x65   :  { %p417_p2 = pnand %p416_p1, %p410_p12 }
  0x66   :  { %272 = vmatmul.mubr.msk.bf16.vlgmr.msra.gmra.mrb[0].mxu0 %vm112_vm1, %v92_v5 }
 0x139   :  { %v150_v9 = vpop.f32.mrb[0].mxu0 }
 0x13a   :  { %v151_v10 = vadd.f32 %v253_v8, %v150_v9  ;;  %v273_v11 = vpop.f32.mrb[1].mxu0 }
 0x13b   :  { %v153_v12 = vpop.f32.mrb[2].mxu0 }
 0x13c   :  { %v159_v13 = vmul.f32 0.02, %v151_v10  ;;  %v154_v14 = vadd.f32 %v253_v8, %v153_v12  ;;  %v274_v15 = vpop.f32.mrb[3].mxu0  ;;  %vm157_vm2 = vcmp.gt.f32.partialorder %v151_v10, 0.0 }
 0x13e   :  { %vm158_vm3 = vcmp.gt.f32.partialorder %v154_v14, 0.0  ;;  %v160_v16 = vmul.f32 0.02, %v154_v14  ;;  %v161_v17 = vsel %vm157_vm2, %v151_v10, %v159_v13 }
 0x140   :  { %v162_v18 = vsel %vm158_vm3, %v154_v14, %v160_v16 }
 0x141   :  { %v167_v19 = vpack.c.bf16 %v162_v18, %v161_v17 }
 0x143   :  { %280 = vmatmul.mubr.msk.bf16.vlgmr.msra.gmra.mrb[0].mxu1 %vm112_vm1, %v167_v19 }
 0x216   :  { %v224_v21 = vpop.f32.mrb[0].mxu1 }
 0x217   :  { %v225_v22 = vadd.f32 %v257_v20, %v224_v21  ;;  %v281_v23 = vpop.f32.mrb[1].mxu1 }
 0x218   :  { %v227_v24 = vpop.f32.mrb[2].mxu1 }
 0x219   :  { %v228_v25 = vadd.f32 %v257_v20, %v227_v24  ;;  %v282_v26 = vpop.f32.mrb[3].mxu1  ;;  %232 = vst.msk [vmem:[#allocation11] sm:$0xff] %vm231_vm4, %v225_v22 }
 0x21b   :  { %233 = vst.msk [vmem:[#allocation11 + $0x8] sm:$0xff] %vm231_vm4, %v228_v25 }
 0x21c   :  { %420 = shalt.err (!%p417_p2)
}
 0x21d   :  { %s421_s9 = scalar_lea.hbm %s566_s5, 256 }
 0x21e   :  { %p422_p3 = scmp.ne.s32.totalorder %s566_s5, %s421_s9  ;;  %p425_p4 = scmp.lt.u32.totalorder %s421_s9, %s566_s5 }
 0x220   :  { %p427_p5 = pnand %p425_p4, %p422_p3 }
 0x222   :  { %430 = shalt.err (!%p427_p5)
}
 0x223   :  { %245 = dma.vmem_to_hbm [thread:$0]  %s240_s30, 256, %s566_s5, [#allocation4], %s444_s3, %s444_s3, %s445_s28  }
 0x224   :  { %437 = dma.done.wait [#allocation4], 256  }
 0x225   :  { %438 = vsyncadd [#allocation4], 4294967040 }
 0x226   :  { %249 = vsyncpa [#allocation3], 1 }
 0x227   :  { %250 = vsyncpa [#allocation6], 1 }
 0x228   :  { %251 = vsyncpa [#allocation9], 1 }
 0x229   :  { %252 = vsyncpa [#allocation4], 1 }

</bundles_post_ra>
